<compile_context>
chip_gen: v6e
topology: v6e:2x2x1
jax: 0.10.0
libtpu: 0.0.40
codegen_flags: <defaults>
</compile_context>

<pallas_src>
import math

import numpy as np
import jax
import jax.numpy as jnp
from jax.experimental import pallas as pl
from jax.experimental.pallas import tpu as pltpu


# ----------------------------- Pallas kernel ------------------------------ #
def _fused_model_kernel(x_ref,
                        l1_ref, c1_ref, b1_ref,
                        l2_ref, c2_ref, b2_ref,
                        l3_ref, c3_ref, b3_ref,
                        o_ref):
    def conv_sigmoid(y, l_ref, c_ref, b_ref):
        # y: (Cin*Hin, Win); l_ref: (KW, O*Hout, Cin*Hin); c_ref: (KW, Win, Wout)
        acc = None
        for j in range(l_ref.shape[0]):          # KW is a static int (1 or 3)
            t = jnp.dot(l_ref[j], y, preferred_element_type=jnp.float32)
            t = jnp.dot(t, c_ref[j], preferred_element_type=jnp.float32)
            acc = t if acc is None else acc + t
        return jax.nn.sigmoid(acc + b_ref[...])

    y = x_ref[...]                                   # (3*64, 64)
    y = conv_sigmoid(y, l1_ref, c1_ref, b1_ref)      # (3*64, 64)
    y = conv_sigmoid(y, l2_ref, c2_ref, b2_ref)      # (3*32, 32)
    y = conv_sigmoid(y, l3_ref, c3_ref, b3_ref)      # (3*16, 16)
    o_ref[...] = y


# ----------------------- weight / geometry packing ------------------------- #
def _out_size(n, k, s, p, d):
    return (n + 2 * p - d * (k - 1) - 1) // s + 1


def _select(n_in, n_out, k, s, p, d):
    """sel[t, out, inp] = 1.0 iff inp == s*out + d*t - p  (conv gather pattern,
    out-of-range taps fall outside [0, n_in) and hence stay zero = padding)."""
    out_idx = np.arange(n_out)[:, None]
    in_idx = np.arange(n_in)[None, :]
    return np.stack(
        [(in_idx == (s * out_idx + d * t - p)).astype(np.float32) for t in range(k)]
    )  # (k, n_out, n_in)


def _pack_conv(w, b, h_in, w_in, *, stride, pad, dil):
    """Pack a Conv2d (OIHW weights) into matmul operands for the fused kernel.

    Returns L: (KW, O*h_out, Cin*h_in), C: (KW, w_in, w_out), b_col: (O*h_out,1)
    such that  conv(y)[o, oh, ow] = sum_j (L[j] @ Yv @ C[j])[o*h_out+oh, ow] + b[o]
    with Yv[c*h_in + h, w] = y[c, h, w].
    """
    o_ch, c_in, kh, kw = w.shape
    h_out = _out_size(h_in, kh, stride, pad, dil)
    w_out = _out_size(w_in, kw, stride, pad, dil)

    row_sel = _select(h_in, h_out, kh, stride, pad, dil)      # (KH, h_out, h_in)
    col_sel = _select(w_in, w_out, kw, stride, pad, dil)      # (KW, w_out, w_in)

    # L[j, o*h_out + oh, c*h_in + h] = sum_i w[o, c, i, j] * row_sel[i, oh, h]
    L = jnp.einsum('ocij,iqh->joqch', w, jnp.asarray(row_sel))
    L = L.reshape(kw, o_ch * h_out, c_in * h_in)
    C = jnp.asarray(np.transpose(col_sel, (0, 2, 1)))         # (KW, w_in, w_out)
    b_col = jnp.repeat(b, h_out)[:, None]                     # (O*h_out, 1)
    return L, C, b_col, o_ch, h_out, w_out


# ------------------------------ forward pass ------------------------------- #
def _model_forward_impl(x, w1, b1, w2, b2, w3, b3):
    n, c_in, h, w = x.shape
    L1, C1, B1, _, h1, w1o = _pack_conv(w1, b1, h, w, stride=1, pad=0, dil=2)
    L2, C2, B2, _, h2, w2o = _pack_conv(w2, b2, h1, w1o, stride=2, pad=1, dil=1)
    L3, C3, B3, o3, h3, w3o = _pack_conv(w3, b3, h2, w2o, stride=2, pad=1, dil=1)

    vmem = pl.BlockSpec(memory_space=pltpu.MemorySpace.VMEM)
    fused = pl.pallas_call(
        _fused_model_kernel,
        out_shape=jax.ShapeDtypeStruct((o3 * h3, w3o), jnp.float32),
        in_specs=[vmem] * 10,      # whole arrays in VMEM, single kernel step
        out_specs=vmem,
    )

    outs = []
    for i in range(n):             # batch = 1 for this model; unrolls under jit
        xv = x[i].reshape(c_in * h, w)                        # free reshape
        y = fused(xv, L1, C1, B1, L2, C2, B2, L3, C3, B3)     # (o3*h3, w3o)
        outs.append(y.reshape(o3, h3, w3o))                   # free reshape
    return jnp.stack(outs, axis=0)


model_forward = jax.jit(_model_forward_impl)


# ------------------------------ reference ---------------------------------- #
def ref_forward(x, w1, b1, w2, b2, w3, b3):
    def conv_sig(x, w, b, stride, pad, dil):
        y = jax.lax.conv_general_dilated(
            x, w,
            window_strides=(stride, stride),
            padding=[(pad, pad), (pad, pad)],
            rhs_dilation=(dil, dil),
            dimension_numbers=("NCHW", "OIHW", "NCHW"),
        )
        return jax.nn.sigmoid(y + b.reshape(1, -1, 1, 1))

    v2 = conv_sig(x, w1, b1, 1, 0, 2)
    v4 = conv_sig(v2, w2, b2, 2, 1, 1)
    v6 = conv_sig(v4, w3, b3, 2, 1, 1)
    return v6


# ------------------------------ params init -------------------------------- #
def init_conv_params(key, out_c, in_c, kh, kw):
    k1, k2 = jax.random.split(key)
    fan_in = in_c * kh * kw
    bound = 1.0 / math.sqrt(fan_in)
    w = jax.random.uniform(k1, (out_c, in_c, kh, kw), jnp.float32, -bound, bound)
    b = jax.random.uniform(k2, (out_c,), jnp.float32, -bound, bound)
    return w, b


if __name__ == "__main__":
    key = jax.random.PRNGKey(0)
    kx, k1, k2, k3 = jax.random.split(key, 4)

    x = jax.random.normal(kx, (1, 3, 64, 64), jnp.float32)
    w1, b1 = init_conv_params(k1, 3, 3, 1, 1)
    w2, b2 = init_conv_params(k2, 3, 3, 3, 3)
    w3, b3 = init_conv_params(k3, 3, 3, 3, 3)

    out = jax.block_until_ready(model_forward(x, w1, b1, w2, b2, w3, b3))
    assert out.shape == (1, 3, 16, 16), out.shape

    ref = jax.block_until_ready(ref_forward(x, w1, b1, w2, b2, w3, b3))
    max_err = float(jnp.abs(out - ref).max())
    assert jnp.allclose(out, ref, atol=3e-5, rtol=1e-5), max_err

    print("KERNEL_OK")
</pallas_src>

<mosaic_0001>
module attributes {stable_mosaic.version = 11 : i64} {
  func.func @_fused_model_kernel(%arg0: memref<192x64xf32, #tpu.memory_space<vmem>>, %arg1: memref<1x192x192xf32, #tpu.memory_space<vmem>>, %arg2: memref<1x64x64xf32, #tpu.memory_space<vmem>>, %arg3: memref<192x1xf32, #tpu.memory_space<vmem>>, %arg4: memref<3x96x192xf32, #tpu.memory_space<vmem>>, %arg5: memref<3x64x32xf32, #tpu.memory_space<vmem>>, %arg6: memref<96x1xf32, #tpu.memory_space<vmem>>, %arg7: memref<3x48x96xf32, #tpu.memory_space<vmem>>, %arg8: memref<3x32x16xf32, #tpu.memory_space<vmem>>, %arg9: memref<48x1xf32, #tpu.memory_space<vmem>>, %arg10: memref<48x16xf32, #tpu.memory_space<vmem>>) attributes {dimension_semantics = [], scalar_prefetch = 0 : i64, scratch_operands = 0 : i64, tpu.core_type = #tpu.core_type<tc>} {
    %c0 = arith.constant 0 : index
    %c0_0 = arith.constant 0 : index
    %0 = vector.load %arg0[%c0, %c0_0] : memref<192x64xf32, #tpu.memory_space<vmem>>, vector<192x64xf32>
    %c0_1 = arith.constant 0 : index
    %c0_2 = arith.constant 0 : index
    %c0_3 = arith.constant 0 : index
    %1 = vector.load %arg1[%c0_1, %c0_2, %c0_3] : memref<1x192x192xf32, #tpu.memory_space<vmem>>, vector<1x192x192xf32>
    %2 = vector.shape_cast %1 : vector<1x192x192xf32> to vector<192x192xf32>
    %cst = arith.constant dense<0.000000e+00> : vector<192x64xf32>
    %3 = tpu.matmul %2, %0, %cst {dimension_numbers = #tpu.dot_dimension_numbers<[1], [0], [0], [1], [0, 0, 1, 1], [], []>} : vector<192x192xf32>, vector<192x64xf32>, vector<192x64xf32> -> vector<192x64xf32>
    %c0_4 = arith.constant 0 : index
    %c0_5 = arith.constant 0 : index
    %c0_6 = arith.constant 0 : index
    %4 = vector.load %arg2[%c0_4, %c0_5, %c0_6] : memref<1x64x64xf32, #tpu.memory_space<vmem>>, vector<1x64x64xf32>
    %5 = vector.shape_cast %4 : vector<1x64x64xf32> to vector<64x64xf32>
    %cst_7 = arith.constant dense<0.000000e+00> : vector<192x64xf32>
    %6 = tpu.matmul %3, %5, %cst_7 {dimension_numbers = #tpu.dot_dimension_numbers<[1], [0], [0], [1], [0, 0, 1, 1], [], []>} : vector<192x64xf32>, vector<64x64xf32>, vector<192x64xf32> -> vector<192x64xf32>
    %c0_8 = arith.constant 0 : index
    %c0_9 = arith.constant 0 : index
    %7 = vector.load %arg3[%c0_8, %c0_9] : memref<192x1xf32, #tpu.memory_space<vmem>>, vector<192x1xf32>
    %8 = vector.broadcast %7 : vector<192x1xf32> to vector<192x64xf32>
    %9 = arith.addf %6, %8 : vector<192x64xf32>
    %10 = arith.negf %9 : vector<192x64xf32>
    %11 = math.exp %10 : vector<192x64xf32>
    %cst_10 = arith.constant 1.000000e+00 : f32
    %12 = vector.broadcast %cst_10 : f32 to vector<192x64xf32>
    %13 = arith.addf %12, %11 : vector<192x64xf32>
    %14 = arith.divf %12, %13 : vector<192x64xf32>
    %c0_11 = arith.constant 0 : index
    %c0_12 = arith.constant 0 : index
    %c0_13 = arith.constant 0 : index
    %15 = vector.load %arg4[%c0_11, %c0_12, %c0_13] : memref<3x96x192xf32, #tpu.memory_space<vmem>>, vector<1x96x192xf32>
    %16 = vector.shape_cast %15 : vector<1x96x192xf32> to vector<96x192xf32>
    %cst_14 = arith.constant dense<0.000000e+00> : vector<96x64xf32>
    %17 = tpu.matmul %16, %14, %cst_14 {dimension_numbers = #tpu.dot_dimension_numbers<[1], [0], [0], [1], [0, 0, 1, 1], [], []>} : vector<96x192xf32>, vector<192x64xf32>, vector<96x64xf32> -> vector<96x64xf32>
    %c0_15 = arith.constant 0 : index
    %c0_16 = arith.constant 0 : index
    %c0_17 = arith.constant 0 : index
    %18 = vector.load %arg5[%c0_15, %c0_16, %c0_17] : memref<3x64x32xf32, #tpu.memory_space<vmem>>, vector<1x64x32xf32>
    %19 = vector.shape_cast %18 : vector<1x64x32xf32> to vector<64x32xf32>
    %cst_18 = arith.constant dense<0.000000e+00> : vector<96x32xf32>
    %20 = tpu.matmul %17, %19, %cst_18 {dimension_numbers = #tpu.dot_dimension_numbers<[1], [0], [0], [1], [0, 0, 1, 1], [], []>} : vector<96x64xf32>, vector<64x32xf32>, vector<96x32xf32> -> vector<96x32xf32>
    %c1 = arith.constant 1 : index
    %c0_19 = arith.constant 0 : index
    %c0_20 = arith.constant 0 : index
    %21 = vector.load %arg4[%c1, %c0_19, %c0_20] : memref<3x96x192xf32, #tpu.memory_space<vmem>>, vector<1x96x192xf32>
    %22 = vector.shape_cast %21 : vector<1x96x192xf32> to vector<96x192xf32>
    %cst_21 = arith.constant dense<0.000000e+00> : vector<96x64xf32>
    %23 = tpu.matmul %22, %14, %cst_21 {dimension_numbers = #tpu.dot_dimension_numbers<[1], [0], [0], [1], [0, 0, 1, 1], [], []>} : vector<96x192xf32>, vector<192x64xf32>, vector<96x64xf32> -> vector<96x64xf32>
    %c1_22 = arith.constant 1 : index
    %c0_23 = arith.constant 0 : index
    %c0_24 = arith.constant 0 : index
    %24 = vector.load %arg5[%c1_22, %c0_23, %c0_24] : memref<3x64x32xf32, #tpu.memory_space<vmem>>, vector<1x64x32xf32>
    %25 = vector.shape_cast %24 : vector<1x64x32xf32> to vector<64x32xf32>
    %cst_25 = arith.constant dense<0.000000e+00> : vector<96x32xf32>
    %26 = tpu.matmul %23, %25, %cst_25 {dimension_numbers = #tpu.dot_dimension_numbers<[1], [0], [0], [1], [0, 0, 1, 1], [], []>} : vector<96x64xf32>, vector<64x32xf32>, vector<96x32xf32> -> vector<96x32xf32>
    %27 = arith.addf %20, %26 : vector<96x32xf32>
    %c2 = arith.constant 2 : index
    %c0_26 = arith.constant 0 : index
    %c0_27 = arith.constant 0 : index
    %28 = vector.load %arg4[%c2, %c0_26, %c0_27] : memref<3x96x192xf32, #tpu.memory_space<vmem>>, vector<1x96x192xf32>
    %29 = vector.shape_cast %28 : vector<1x96x192xf32> to vector<96x192xf32>
    %cst_28 = arith.constant dense<0.000000e+00> : vector<96x64xf32>
    %30 = tpu.matmul %29, %14, %cst_28 {dimension_numbers = #tpu.dot_dimension_numbers<[1], [0], [0], [1], [0, 0, 1, 1], [], []>} : vector<96x192xf32>, vector<192x64xf32>, vector<96x64xf32> -> vector<96x64xf32>
    %c2_29 = arith.constant 2 : index
    %c0_30 = arith.constant 0 : index
    %c0_31 = arith.constant 0 : index
    %31 = vector.load %arg5[%c2_29, %c0_30, %c0_31] : memref<3x64x32xf32, #tpu.memory_space<vmem>>, vector<1x64x32xf32>
    %32 = vector.shape_cast %31 : vector<1x64x32xf32> to vector<64x32xf32>
    %cst_32 = arith.constant dense<0.000000e+00> : vector<96x32xf32>
    %33 = tpu.matmul %30, %32, %cst_32 {dimension_numbers = #tpu.dot_dimension_numbers<[1], [0], [0], [1], [0, 0, 1, 1], [], []>} : vector<96x64xf32>, vector<64x32xf32>, vector<96x32xf32> -> vector<96x32xf32>
    %34 = arith.addf %27, %33 : vector<96x32xf32>
    %c0_33 = arith.constant 0 : index
    %c0_34 = arith.constant 0 : index
    %35 = vector.load %arg6[%c0_33, %c0_34] : memref<96x1xf32, #tpu.memory_space<vmem>>, vector<96x1xf32>
    %36 = vector.broadcast %35 : vector<96x1xf32> to vector<96x32xf32>
    %37 = arith.addf %34, %36 : vector<96x32xf32>
    %38 = arith.negf %37 : vector<96x32xf32>
    %39 = math.exp %38 : vector<96x32xf32>
    %cst_35 = arith.constant 1.000000e+00 : f32
    %40 = vector.broadcast %cst_35 : f32 to vector<96x32xf32>
    %41 = arith.addf %40, %39 : vector<96x32xf32>
    %42 = arith.divf %40, %41 : vector<96x32xf32>
    %c0_36 = arith.constant 0 : index
    %c0_37 = arith.constant 0 : index
    %c0_38 = arith.constant 0 : index
    %43 = vector.load %arg7[%c0_36, %c0_37, %c0_38] : memref<3x48x96xf32, #tpu.memory_space<vmem>>, vector<1x48x96xf32>
    %44 = vector.shape_cast %43 : vector<1x48x96xf32> to vector<48x96xf32>
    %cst_39 = arith.constant dense<0.000000e+00> : vector<48x32xf32>
    %45 = tpu.matmul %44, %42, %cst_39 {dimension_numbers = #tpu.dot_dimension_numbers<[1], [0], [0], [1], [0, 0, 1, 1], [], []>} : vector<48x96xf32>, vector<96x32xf32>, vector<48x32xf32> -> vector<48x32xf32>
    %c0_40 = arith.constant 0 : index
    %c0_41 = arith.constant 0 : index
    %c0_42 = arith.constant 0 : index
    %46 = vector.load %arg8[%c0_40, %c0_41, %c0_42] : memref<3x32x16xf32, #tpu.memory_space<vmem>>, vector<1x32x16xf32>
    %47 = vector.shape_cast %46 : vector<1x32x16xf32> to vector<32x16xf32>
    %cst_43 = arith.constant dense<0.000000e+00> : vector<48x16xf32>
    %48 = tpu.matmul %45, %47, %cst_43 {dimension_numbers = #tpu.dot_dimension_numbers<[1], [0], [0], [1], [0, 0, 1, 1], [], []>} : vector<48x32xf32>, vector<32x16xf32>, vector<48x16xf32> -> vector<48x16xf32>
    %c1_44 = arith.constant 1 : index
    %c0_45 = arith.constant 0 : index
    %c0_46 = arith.constant 0 : index
    %49 = vector.load %arg7[%c1_44, %c0_45, %c0_46] : memref<3x48x96xf32, #tpu.memory_space<vmem>>, vector<1x48x96xf32>
    %50 = vector.shape_cast %49 : vector<1x48x96xf32> to vector<48x96xf32>
    %cst_47 = arith.constant dense<0.000000e+00> : vector<48x32xf32>
    %51 = tpu.matmul %50, %42, %cst_47 {dimension_numbers = #tpu.dot_dimension_numbers<[1], [0], [0], [1], [0, 0, 1, 1], [], []>} : vector<48x96xf32>, vector<96x32xf32>, vector<48x32xf32> -> vector<48x32xf32>
    %c1_48 = arith.constant 1 : index
    %c0_49 = arith.constant 0 : index
    %c0_50 = arith.constant 0 : index
    %52 = vector.load %arg8[%c1_48, %c0_49, %c0_50] : memref<3x32x16xf32, #tpu.memory_space<vmem>>, vector<1x32x16xf32>
    %53 = vector.shape_cast %52 : vector<1x32x16xf32> to vector<32x16xf32>
    %cst_51 = arith.constant dense<0.000000e+00> : vector<48x16xf32>
    %54 = tpu.matmul %51, %53, %cst_51 {dimension_numbers = #tpu.dot_dimension_numbers<[1], [0], [0], [1], [0, 0, 1, 1], [], []>} : vector<48x32xf32>, vector<32x16xf32>, vector<48x16xf32> -> vector<48x16xf32>
    %55 = arith.addf %48, %54 : vector<48x16xf32>
    %c2_52 = arith.constant 2 : index
    %c0_53 = arith.constant 0 : index
    %c0_54 = arith.constant 0 : index
    %56 = vector.load %arg7[%c2_52, %c0_53, %c0_54] : memref<3x48x96xf32, #tpu.memory_space<vmem>>, vector<1x48x96xf32>
    %57 = vector.shape_cast %56 : vector<1x48x96xf32> to vector<48x96xf32>
    %cst_55 = arith.constant dense<0.000000e+00> : vector<48x32xf32>
    %58 = tpu.matmul %57, %42, %cst_55 {dimension_numbers = #tpu.dot_dimension_numbers<[1], [0], [0], [1], [0, 0, 1, 1], [], []>} : vector<48x96xf32>, vector<96x32xf32>, vector<48x32xf32> -> vector<48x32xf32>
    %c2_56 = arith.constant 2 : index
    %c0_57 = arith.constant 0 : index
    %c0_58 = arith.constant 0 : index
    %59 = vector.load %arg8[%c2_56, %c0_57, %c0_58] : memref<3x32x16xf32, #tpu.memory_space<vmem>>, vector<1x32x16xf32>
    %60 = vector.shape_cast %59 : vector<1x32x16xf32> to vector<32x16xf32>
    %cst_59 = arith.constant dense<0.000000e+00> : vector<48x16xf32>
    %61 = tpu.matmul %58, %60, %cst_59 {dimension_numbers = #tpu.dot_dimension_numbers<[1], [0], [0], [1], [0, 0, 1, 1], [], []>} : vector<48x32xf32>, vector<32x16xf32>, vector<48x16xf32> -> vector<48x16xf32>
    %62 = arith.addf %55, %61 : vector<48x16xf32>
    %c0_60 = arith.constant 0 : index
    %c0_61 = arith.constant 0 : index
    %63 = vector.load %arg9[%c0_60, %c0_61] : memref<48x1xf32, #tpu.memory_space<vmem>>, vector<48x1xf32>
    %64 = vector.broadcast %63 : vector<48x1xf32> to vector<48x16xf32>
    %65 = arith.addf %62, %64 : vector<48x16xf32>
    %66 = arith.negf %65 : vector<48x16xf32>
    %67 = math.exp %66 : vector<48x16xf32>
    %cst_62 = arith.constant 1.000000e+00 : f32
    %68 = vector.broadcast %cst_62 : f32 to vector<48x16xf32>
    %69 = arith.addf %68, %67 : vector<48x16xf32>
    %70 = arith.divf %68, %69 : vector<48x16xf32>
    %c0_63 = arith.constant 0 : index
    %c0_64 = arith.constant 0 : index
    %71 = vector.load %arg10[%c0_63, %c0_64] : memref<48x16xf32, #tpu.memory_space<vmem>>, vector<48x16xf32>
    tpu.vector_store %arg10[%c0_63, %c0_64], %70 {strides = array<i32>} : memref<48x16xf32, #tpu.memory_space<vmem>>, vector<48x16xf32>,
    return
  }
}

</mosaic_0001>

<bundles_post_ra>
// kernel: _model_forward_impl.1
= control target key start
LH: loop header
LB: loop body
LE: loop exit
PB: predicated region body
PF: predicated region fallthrough
CT: control target
= control target key end

     0   :  { %v3933_v1 = vmov 0.0   ;;  %vm108_vm0 = vcmask 523264   ;;  %s5271_s0 = inlined_call_operand.vmem [shape: f32[192,64], index: 0, kind: input, shape index: {}]   ;;  %s5272_s1 = inlined_call_operand.vmem [shape: f32[1,192,192], index: 1, kind: input, shape index: {}]   ;;  %s5273_s2 = inlined_call_operand.vmem [shape: f32[1,64,64], index: 2, kind: input, shape index: {}]   ;;  %s5274_s3 = inlined_call_operand.vmem [shape: f32[192,1], index: 3, kind: input, shape index: {}]   ;;  %s5275_s4 = inlined_call_operand.vmem [shape: f32[3,96,192], index: 4, kind: input, shape index: {}]   ;;  %s5276_s5 = inlined_call_operand.vmem [shape: f32[3,64,32], index: 5, kind: input, shape index: {}]   ;;  %s5277_s6 = inlined_call_operand.vmem [shape: f32[96,1], index: 6, kind: input, shape index: {}]   ;;  %s5278_s7 = inlined_call_operand.vmem [shape: f32[3,48,96], index: 7, kind: input, shape index: {}]   ;;  %s5279_s8 = inlined_call_operand.vmem [shape: f32[3,32,16], index: 8, kind: input, shape index: {}]   ;;  %s5280_s9 = inlined_call_operand.vmem [shape: f32[48,1], index: 9, kind: input, shape index: {}]   ;;  %s5281_s10 = inlined_call_operand.hbm [shape: f32[48,16], index: 10, kind: output, shape index: {}]  }
   0x1   :  { %v51_v0 = vld [vmem:[%s5271_s0 + $0x78] sm:$0xff]  ;;  %181 = vmatprep.subr.mxu0 %v3933_v1  ;;  %v50_v2 = vld [vmem:[%s5271_s0 + $0x70] sm:$0xff]  ;;  %v49_v3 = vld [vmem:[%s5271_s0 + $0x68] sm:$0xff] }
   0x2   :  { %182 = vmatpush1.msra.mxu0 %v51_v0  ;;  %v48_v4 = vld [vmem:[%s5271_s0 + $0x60] sm:$0xff]  ;;  %v47_v5 = vld [vmem:[%s5271_s0 + $0x58] sm:$0xff]  ;;  %v61_v6 = vld [vmem:[%s5272_s1 + $0x8] sm:$0xff] }
   0x3   :  { %183 = vmatprep.subr.mxu0 %v3933_v1  ;;  %v46_v7 = vld [vmem:[%s5271_s0 + $0x50] sm:$0xff]  ;;  %2974 = vmatprep.mubr.msk.f32.mxu0 %vm108_vm0, %v61_v6  ;;  %v45_v8 = vld [vmem:[%s5271_s0 + $0x48] sm:$0xff]  ;;  %v44_v9 = vld [vmem:[%s5271_s0 + $0x40] sm:$0xff] }
   0x4   :  { %184 = vmatpush1.msra.mxu0 %v50_v2  ;;  %v43_v10 = vld [vmem:[%s5271_s0 + $0x38] sm:$0xff]  ;;  %v42_v11 = vld [vmem:[%s5271_s0 + $0x30] sm:$0xff]  ;;  %v41_v12 = vld [vmem:[%s5271_s0 + $0x28] sm:$0xff] }
   0x5   :  { %185 = vmatprep.subr.mxu0 %v3933_v1  ;;  %v40_v13 = vld [vmem:[%s5271_s0 + $0x20] sm:$0xff]  ;;  %v39_v14 = vld [vmem:[%s5271_s0 + $0x18] sm:$0xff]  ;;  %v372_v16 = vld [vmem:[%s5273_s2 + $0x30] sm:$0xff] }
   0x6   :  { %186 = vmatpush1.msra.mxu0 %v49_v3  ;;  %v373_v15 = vld [vmem:[%s5273_s2 + $0x38] sm:$0xff]  ;;  %v38_v17 = vld [vmem:[%s5271_s0 + $0x10] sm:$0xff]  ;;  %v371_v18 = vld [vmem:[%s5273_s2 + $0x28] sm:$0xff] }
   0x7   :  { %187 = vmatprep.subr.mxu0 %v3933_v1  ;;  %3432 = vmatprep.subr.mxu1 %v373_v15 }
   0x8   :  { %188 = vmatpush1.msra.mxu0 %v48_v4  ;;  %3433 = vmatpush3.msra.mxu1 %v373_v15 }
   0x9   :  { %189 = vmatprep.subr.mxu0 %v3933_v1 }
   0xa   :  { %190 = vmatpush1.msra.mxu0 %v47_v5 }
   0xb   :  { %191 = vmatprep.subr.mxu0 %v3933_v1 }
   0xc   :  { %192 = vmatpush1.msra.mxu0 %v46_v7 }
   0xd   :  { %193 = vmatprep.subr.mxu0 %v3933_v1 }
   0xe   :  { %194 = vmatpush1.msra.mxu0 %v45_v8 }
   0xf   :  { %195 = vmatprep.subr.mxu0 %v3933_v1 }
  0x10   :  { %196 = vmatpush1.msra.mxu0 %v44_v9 }
  0x11   :  { %197 = vmatprep.subr.mxu0 %v3933_v1 }
  0x12   :  { %198 = vmatpush1.msra.mxu0 %v43_v10 }
  0x13   :  { %199 = vmatprep.subr.mxu0 %v3933_v1 }
  0x14   :  { %200 = vmatpush1.msra.mxu0 %v42_v11 }
  0x15   :  { %201 = vmatprep.subr.mxu0 %v3933_v1 }
  0x16   :  { %202 = vmatpush1.msra.mxu0 %v41_v12 }
  0x17   :  { %203 = vmatprep.subr.mxu0 %v3933_v1 }
  0x18   :  { %204 = vmatpush1.msra.mxu0 %v40_v13 }
  0x19   :  { %205 = vmatprep.subr.mxu0 %v3933_v1 }
  0x1a   :  { %206 = vmatpush1.msra.mxu0 %v39_v14 }
  0x1b   :  { %15 = vsyncpa [#allocation3], 0  ;;  %207 = vmatprep.subr.mxu0 %v3933_v1  ;;  %v37_v19 = vld [vmem:[%s5271_s0 + $0x8] sm:$0xff]  ;;  %3434 = vmatprep.subr.mxu1 %v372_v16  ;;  %v370_v20 = vld [vmem:[%s5273_s2 + $0x20] sm:$0xff]  ;;  %vm2159_vm1 = vcmask 785408   ;;  %vm2402_vm2 = vcmask 261120  }
  0x1c   :  { %208 = vmatpush1.msra.mxu0 %v38_v17  ;;  %3435 = vmatpush3.msra.mxu1 %v372_v16  ;;  %v36_v21 = vld [vmem:[%s5271_s0] sm:$0xff]  ;;  %v369_v22 = vld [vmem:[%s5273_s2 + $0x18] sm:$0xff]  ;;  %v368_v24 = vld [vmem:[%s5273_s2 + $0x10] sm:$0xff]  ;;  %vm2951_vm3 = vcmask 130048  }
  0x1d   :  { %209 = vmatprep.subr.mxu0 %v3933_v1  ;;  %3436 = vmatprep.subr.mxu1 %v371_v18  ;;  %v59_v23 = vld [vmem:[%s5271_s0 + $0xb8] sm:$0xff]  ;;  %v58_v25 = vld [vmem:[%s5271_s0 + $0xb0] sm:$0xff]  ;;  %v57_v26 = vld [vmem:[%s5271_s0 + $0xa8] sm:$0xff] }
  0x1e   :  { %210 = vmatpush1.msra.mxu0 %v37_v19  ;;  %3437 = vmatpush3.msra.mxu1 %v371_v18  ;;  %v56_v27 = vld [vmem:[%s5271_s0 + $0xa0] sm:$0xff]  ;;  %v55_v28 = vld [vmem:[%s5271_s0 + $0x98] sm:$0xff]  ;;  %v54_v29 = vld [vmem:[%s5271_s0 + $0x90] sm:$0xff]  ;;  %v3934_v18 = vmov 0  }
  0x1f   :  { %211 = vmatprep.subr.mxu0 %v3933_v1  ;;  %3438 = vmatprep.subr.mxu1 %v370_v20  ;;  %v53_v30 = vld [vmem:[%s5271_s0 + $0x88] sm:$0xff]  ;;  %v52_v31 = vld [vmem:[%s5271_s0 + $0x80] sm:$0xff]  ;;  %v63_v33 = vld [vmem:[%s5272_s1 + $0x18] sm:$0xff] }
  0x20   :  { %212 = vmatpush1.msra.mxu0 %v36_v21  ;;  %3439 = vmatpush3.msra.mxu1 %v370_v20  ;;  %v60_v32 = vld [vmem:[%s5272_s1] sm:$0xff]  ;;  %v62_v34 = vld [vmem:[%s5272_s1 + $0x10] sm:$0xff]  ;;  %v65_v35 = vld [vmem:[%s5272_s1 + $0x28] sm:$0xff] }
  0x21   :  { %229 = vmatprep.subr.mxu0 %v3933_v1  ;;  %3440 = vmatprep.subr.mxu1 %v369_v22  ;;  %v64_v36 = vld [vmem:[%s5272_s1 + $0x20] sm:$0xff]  ;;  %v67_v37 = vld [vmem:[%s5272_s1 + $0x38] sm:$0xff]  ;;  %v66_v38 = vld [vmem:[%s5272_s1 + $0x30] sm:$0xff] }
  0x22   :  { %230 = vmatpush2.msra.mxu0 %v59_v23  ;;  %3441 = vmatpush3.msra.mxu1 %v369_v22  ;;  %v69_v39 = vld [vmem:[%s5272_s1 + $0x48] sm:$0xff]  ;;  %v68_v40 = vld [vmem:[%s5272_s1 + $0x40] sm:$0xff]  ;;  %v71_v41 = vld [vmem:[%s5272_s1 + $0x58] sm:$0xff] }
  0x23   :  { %231 = vmatprep.subr.mxu0 %v3933_v1  ;;  %3442 = vmatprep.subr.mxu1 %v368_v24  ;;  %v70_v42 = vld [vmem:[%s5272_s1 + $0x50] sm:$0xff]  ;;  %v73_v43 = vld [vmem:[%s5272_s1 + $0x68] sm:$0xff]  ;;  %v72_v44 = vld [vmem:[%s5272_s1 + $0x60] sm:$0xff] }
  0x24   :  { %232 = vmatpush2.msra.mxu0 %v58_v25  ;;  %3443 = vmatpush3.msra.mxu1 %v368_v24  ;;  %v75_v45 = vld [vmem:[%s5272_s1 + $0x78] sm:$0xff]  ;;  %v74_v46 = vld [vmem:[%s5272_s1 + $0x70] sm:$0xff]  ;;  %v77_v47 = vld [vmem:[%s5272_s1 + $0x88] sm:$0xff] }
  0x25   :  { %233 = vmatprep.subr.mxu0 %v3933_v1  ;;  %v76_v48 = vld [vmem:[%s5272_s1 + $0x80] sm:$0xff]  ;;  %v79_v49 = vld [vmem:[%s5272_s1 + $0x98] sm:$0xff]  ;;  %v78_v50 = vld [vmem:[%s5272_s1 + $0x90] sm:$0xff]  ;;  %3741 = vset.pattern.permute.xlu0 %v3934_v18 }
  0x26   :  { %234 = vmatpush2.msra.mxu0 %v57_v26  ;;  %v81_v51 = vld [vmem:[%s5272_s1 + $0xa8] sm:$0xff]  ;;  %v80_v52 = vld [vmem:[%s5272_s1 + $0xa0] sm:$0xff]  ;;  %v83_v53 = vld [vmem:[%s5272_s1 + $0xb8] sm:$0xff]  ;;  %3742 = vset.pattern.permute.xlu1 %v3934_v18 }
  0x27   :  { %235 = vmatprep.subr.mxu0 %v3933_v1  ;;  %v82_v54 = vld [vmem:[%s5272_s1 + $0xb0] sm:$0xff]  ;;  %v85_v55 = vld [vmem:[%s5272_s1 + $0xc8] sm:$0xff]  ;;  %v84_v56 = vld [vmem:[%s5272_s1 + $0xc0] sm:$0xff] }
  0x28   :  { %236 = vmatpush2.msra.mxu0 %v56_v27  ;;  %v87_v57 = vld [vmem:[%s5272_s1 + $0xd8] sm:$0xff]  ;;  %v86_v58 = vld [vmem:[%s5272_s1 + $0xd0] sm:$0xff]  ;;  %v89_v59 = vld [vmem:[%s5272_s1 + $0xe8] sm:$0xff] }
  0x29   :  { %237 = vmatprep.subr.mxu0 %v3933_v1  ;;  %v88_v60 = vld [vmem:[%s5272_s1 + $0xe0] sm:$0xff]  ;;  %v91_v61 = vld [vmem:[%s5272_s1 + $0xf8] sm:$0xff]  ;;  %v90_v62 = vld [vmem:[%s5272_s1 + $0xf0] sm:$0xff] }
  0x2a   :  { %238 = vmatpush2.msra.mxu0 %v55_v28  ;;  %v93_v63 = vld [vmem:[%s5272_s1 + $0x108] sm:$0xff]  ;;  %v92_v0 = vld [vmem:[%s5272_s1 + $0x100] sm:$0xff]  ;;  %v95_v2 = vld [vmem:[%s5272_s1 + $0x118] sm:$0xff] }
  0x2b   :  { %239 = vmatprep.subr.mxu0 %v3933_v1  ;;  %v367_v3 = vld [vmem:[%s5273_s2 + $0x8] sm:$0xff]  ;;  %v94_v4 = vld [vmem:[%s5272_s1 + $0x110] sm:$0xff]  ;;  %v366_v6 = vld [vmem:[%s5273_s2] sm:$0xff] }
  0x2c   :  { %240 = vmatpush2.msra.mxu0 %v54_v29  ;;  %3444 = vmatprep.subr.mxu1 %v367_v3  ;;  %v97_v5 = vld [vmem:[%s5272_s1 + $0x128] sm:$0xff]  ;;  %v96_v7 = vld [vmem:[%s5272_s1 + $0x120] sm:$0xff]  ;;  %v99_v8 = vld [vmem:[%s5272_s1 + $0x138] sm:$0xff] }
  0x2d   :  { %241 = vmatprep.subr.mxu0 %v3933_v1  ;;  %3445 = vmatpush3.msra.mxu1 %v367_v3  ;;  %v98_v9 = vld [vmem:[%s5272_s1 + $0x130] sm:$0xff]  ;;  %v101_v10 = vld [vmem:[%s5272_s1 + $0x148] sm:$0xff]  ;;  %v100_v11 = vld [vmem:[%s5272_s1 + $0x140] sm:$0xff] }
  0x2e   :  { %242 = vmatpush2.msra.mxu0 %v53_v30  ;;  %3446 = vmatprep.subr.mxu1 %v366_v6  ;;  %v103_v12 = vld [vmem:[%s5272_s1 + $0x158] sm:$0xff]  ;;  %v102_v13 = vld [vmem:[%s5272_s1 + $0x150] sm:$0xff]  ;;  %v105_v14 = vld [vmem:[%s5272_s1 + $0x168] sm:$0xff] }
  0x2f   :  { %243 = vmatprep.subr.mxu0 %v3933_v1  ;;  %3447 = vmatpush3.msra.mxu1 %v366_v6  ;;  %v104_v15 = vld [vmem:[%s5272_s1 + $0x160] sm:$0xff]  ;;  %v107_v16 = vld [vmem:[%s5272_s1 + $0x178] sm:$0xff]  ;;  %v106_v17 = vld [vmem:[%s5272_s1 + $0x170] sm:$0xff] }
  0x30   :  { %244 = vmatpush2.msra.mxu0 %v52_v31  ;;  %979 = vmatprep.subr.mxu1 %v3933_v1  ;;  %v389_v19 = vld [vmem:[%s5274_s3 + $0x78] sm:$0xff]  ;;  %v387_v20 = vld [vmem:[%s5274_s3 + $0x68] sm:$0xff]  ;;  %v388_v21 = vld [vmem:[%s5274_s3 + $0x70] sm:$0xff] }
  0x31   :  { %246 = vmatmul.mubr.f32.vlgmr.msra.gmra.mxu0 %v60_v32  ;;  %475 = vperm.xlu0 %3741, %v389_v19   ;;  %v386_v22 = vld [vmem:[%s5274_s3 + $0x60] sm:$0xff]  ;;  %v385_v23 = vld [vmem:[%s5274_s3 + $0x58] sm:$0xff]  ;;  %v384_v24 = vld [vmem:[%s5274_s3 + $0x50] sm:$0xff] }
  0x32   :  { %2975 = vmatprep.mubr.msk.f32.mxu0 %vm108_vm0, %v63_v33  ;;  %465 = vperm.xlu1 %3742, %v387_v20   ;;  %v383_v25 = vld [vmem:[%s5274_s3 + $0x48] sm:$0xff]  ;;  %v382_v26 = vld [vmem:[%s5274_s3 + $0x40] sm:$0xff]  ;;  %v381_v27 = vld [vmem:[%s5274_s3 + $0x38] sm:$0xff] }
  0x33   :  { %v380_v28 = vld [vmem:[%s5274_s3 + $0x30] sm:$0xff]  ;;  %v379_v29 = vld [vmem:[%s5274_s3 + $0x28] sm:$0xff]  ;;  %v378_v30 = vld [vmem:[%s5274_s3 + $0x20] sm:$0xff] }
  0x34   :  { %v377_v31 = vld [vmem:[%s5274_s3 + $0x18] sm:$0xff]  ;;  %v376_v32 = vld [vmem:[%s5274_s3 + $0x10] sm:$0xff]  ;;  %v375_v33 = vld [vmem:[%s5274_s3 + $0x8] sm:$0xff] }
  0x35   :  { %251 = vmatmul.mubr.f32.gmra.mxu0 %v62_v34  ;;  %470 = vperm.xlu0 %3741, %v388_v21   ;;  %v374_v34 = vld [vmem:[%s5274_s3] sm:$0xff] }
  0x36   :  { %2976 = vmatprep.mubr.msk.f32.mxu0 %vm108_vm0, %v65_v35  ;;  %460 = vperm.xlu1 %3742, %v386_v22   ;;  %v397_v35 = vld [vmem:[%s5274_s3 + $0xb8] sm:$0xff] }
  0x39   :  { %256 = vmatmul.mubr.f32.gmra.mxu0 %v64_v36  ;;  %455 = vperm.xlu0 %3741, %v385_v23   ;;  %v395_v36 = vld [vmem:[%s5274_s3 + $0xa8] sm:$0xff] }
  0x3a   :  { %2977 = vmatprep.mubr.msk.f32.mxu0 %vm108_vm0, %v67_v37  ;;  %450 = vperm.xlu1 %3742, %v384_v24   ;;  %v396_v37 = vld [vmem:[%s5274_s3 + $0xb0] sm:$0xff] }
  0x3d   :  { %261 = vmatmul.mubr.f32.gmra.mxu0 %v66_v38  ;;  %445 = vperm.xlu0 %3741, %v383_v25   ;;  %v393_v38 = vld [vmem:[%s5274_s3 + $0x98] sm:$0xff] }
  0x3e   :  { %2978 = vmatprep.mubr.msk.f32.mxu0 %vm108_vm0, %v69_v39  ;;  %440 = vperm.xlu1 %3742, %v382_v26   ;;  %v394_v39 = vld [vmem:[%s5274_s3 + $0xa0] sm:$0xff] }
  0x41   :  { %266 = vmatmul.mubr.f32.gmra.mxu0 %v68_v40  ;;  %435 = vperm.xlu0 %3741, %v381_v27   ;;  %v391_v40 = vld [vmem:[%s5274_s3 + $0x88] sm:$0xff] }
  0x42   :  { %2979 = vmatprep.mubr.msk.f32.mxu0 %vm108_vm0, %v71_v41  ;;  %430 = vperm.xlu1 %3742, %v380_v28   ;;  %v392_v41 = vld [vmem:[%s5274_s3 + $0x90] sm:$0xff] }
  0x45   :  { %271 = vmatmul.mubr.f32.gmra.mxu0 %v70_v42  ;;  %425 = vperm.xlu0 %3741, %v379_v29   ;;  %v2008_v42 = vld [vmem:[%s5277_s6 + $0x58] sm:$0xff] }
  0x46   :  { %2980 = vmatprep.mubr.msk.f32.mxu0 %vm108_vm0, %v73_v43  ;;  %420 = vperm.xlu1 %3742, %v378_v30   ;;  %v390_v43 = vld [vmem:[%s5274_s3 + $0x80] sm:$0xff] }
  0x49   :  { %276 = vmatmul.mubr.f32.gmra.mxu0 %v72_v44  ;;  %415 = vperm.xlu0 %3741, %v377_v31   ;;  %v2006_v44 = vld [vmem:[%s5277_s6 + $0x48] sm:$0xff] }
  0x4a   :  { %2981 = vmatprep.mubr.msk.f32.mxu0 %vm108_vm0, %v75_v45  ;;  %410 = vperm.xlu1 %3742, %v376_v32   ;;  %v2007_v45 = vld [vmem:[%s5277_s6 + $0x50] sm:$0xff] }
  0x4d   :  { %281 = vmatmul.mubr.f32.gmra.mxu0 %v74_v46  ;;  %405 = vperm.xlu0 %3741, %v375_v33   ;;  %v2004_v46 = vld [vmem:[%s5277_s6 + $0x38] sm:$0xff] }
  0x4e   :  { %2982 = vmatprep.mubr.msk.f32.mxu0 %vm108_vm0, %v77_v47  ;;  %400 = vperm.xlu1 %3742, %v374_v34   ;;  %v2005_v47 = vld [vmem:[%s5277_s6 + $0x40] sm:$0xff] }
  0x51   :  { %286 = vmatmul.mubr.f32.gmra.mxu0 %v76_v48  ;;  %515 = vperm.xlu0 %3741, %v397_v35   ;;  %v2002_v48 = vld [vmem:[%s5277_s6 + $0x28] sm:$0xff] }
  0x52   :  { %2983 = vmatprep.mubr.msk.f32.mxu0 %vm108_vm0, %v79_v49  ;;  %510 = vperm.xlu1 %3742, %v396_v37   ;;  %v2003_v49 = vld [vmem:[%s5277_s6 + $0x30] sm:$0xff] }
  0x55   :  { %291 = vmatmul.mubr.f32.gmra.mxu0 %v78_v50  ;;  %505 = vperm.xlu0 %3741, %v395_v36   ;;  %v2000_v50 = vld [vmem:[%s5277_s6 + $0x18] sm:$0xff] }
  0x56   :  { %2984 = vmatprep.mubr.msk.f32.mxu0 %vm108_vm0, %v81_v51  ;;  %500 = vperm.xlu1 %3742, %v394_v39   ;;  %v2001_v51 = vld [vmem:[%s5277_s6 + $0x20] sm:$0xff] }
  0x59   :  { %296 = vmatmul.mubr.f32.gmra.mxu0 %v80_v52  ;;  %495 = vperm.xlu0 %3741, %v393_v38   ;;  %v1998_v52 = vld [vmem:[%s5277_s6 + $0x8] sm:$0xff] }
  0x5a   :  { %2985 = vmatprep.mubr.msk.f32.mxu0 %vm108_vm0, %v83_v53  ;;  %490 = vperm.xlu1 %3742, %v392_v41   ;;  %v1999_v53 = vld [vmem:[%s5277_s6 + $0x10] sm:$0xff] }
  0x5d   :  { %301 = vmatmul.mubr.f32.gmra.mxu0 %v82_v54  ;;  %485 = vperm.xlu0 %3741, %v391_v40   ;;  %v2873_v54 = vld [vmem:[%s5280_s9] sm:$0xff] }
  0x5e   :  { %2986 = vmatprep.mubr.msk.f32.mxu0 %vm108_vm0, %v85_v55  ;;  %480 = vperm.xlu1 %3742, %v390_v43   ;;  %v1997_v55 = vld [vmem:[%s5277_s6] sm:$0xff] }
  0x61   :  { %306 = vmatmul.mubr.f32.gmra.mxu0 %v84_v56  ;;  %2066 = vperm.xlu0 %3741, %v2008_v42   ;;  %v2875_v56 = vld [vmem:[%s5280_s9 + $0x10] sm:$0xff] }
  0x62   :  { %2987 = vmatprep.mubr.msk.f32.mxu0 %vm108_vm0, %v87_v57  ;;  %2061 = vperm.xlu1 %3742, %v2007_v45   ;;  %v2874_v57 = vld [vmem:[%s5280_s9 + $0x8] sm:$0xff] }
  0x65   :  { %311 = vmatmul.mubr.f32.gmra.mxu0 %v86_v58  ;;  %2056 = vperm.xlu0 %3741, %v2006_v44   ;;  %v2877_v58 = vld [vmem:[%s5280_s9 + $0x20] sm:$0xff] }
  0x66   :  { %2988 = vmatprep.mubr.msk.f32.mxu0 %vm108_vm0, %v89_v59  ;;  %2051 = vperm.xlu1 %3742, %v2005_v47   ;;  %v2876_v59 = vld [vmem:[%s5280_s9 + $0x18] sm:$0xff] }
  0x69   :  { %316 = vmatmul.mubr.f32.gmra.mxu0 %v88_v60  ;;  %2046 = vperm.xlu0 %3741, %v2004_v46   ;;  %v920_v46 = vld [vmem:[%s5275_s4 + $0x8] sm:$0xff] }
  0x6a   :  { %2989 = vmatprep.mubr.msk.f32.mxu0 %vm108_vm0, %v91_v61  ;;  %2041 = vperm.xlu1 %3742, %v2003_v49   ;;  %v2878_v61 = vld [vmem:[%s5280_s9 + $0x28] sm:$0xff] }
  0x6d   :  { %321 = vmatmul.mubr.f32.gmra.mxu0 %v90_v62  ;;  %2036 = vperm.xlu0 %3741, %v2002_v48  }
  0x6e   :  { %2990 = vmatprep.mubr.msk.f32.mxu0 %vm108_vm0, %v93_v63  ;;  %2031 = vperm.xlu1 %3742, %v2001_v51  }
  0x71   :  { %326 = vmatmul.mubr.f32.gmra.mxu0 %v92_v0  ;;  %2026 = vperm.xlu0 %3741, %v2000_v50  }
  0x72   :  { %2991 = vmatprep.mubr.msk.f32.mxu0 %vm108_vm0, %v95_v2  ;;  %2021 = vperm.xlu1 %3742, %v1999_v53  }
  0x75   :  { %331 = vmatmul.mubr.f32.gmra.mxu0 %v94_v4  ;;  %2016 = vperm.xlu0 %3741, %v1998_v52  }
  0x76   :  { %2992 = vmatprep.mubr.msk.f32.mxu0 %vm108_vm0, %v97_v5  ;;  %2011 = vperm.xlu1 %3742, %v1997_v55  }
  0x79   :  { %336 = vmatmul.mubr.f32.gmra.mxu0 %v96_v7  ;;  %2881 = vperm.xlu0 %3741, %v2873_v54  }
  0x7a   :  { %2993 = vmatprep.mubr.msk.f32.mxu0 %vm108_vm0, %v99_v8  ;;  %2886 = vperm.xlu1 %3742, %v2874_v57  }
  0x7d   :  { %341 = vmatmul.mubr.f32.gmra.mxu0 %v98_v9  ;;  %2891 = vperm.xlu0 %3741, %v2875_v56  }
  0x7e   :  { %2994 = vmatprep.mubr.msk.f32.mxu0 %vm108_vm0, %v101_v10  ;;  %2896 = vperm.xlu1 %3742, %v2876_v59  }
  0x81   :  { %346 = vmatmul.mubr.f32.gmra.mxu0 %v100_v11  ;;  %2901 = vperm.xlu0 %3741, %v2877_v58  }
  0x82   :  { %2995 = vmatprep.mubr.msk.f32.mxu0 %vm108_vm0, %v103_v12  ;;  %2906 = vperm.xlu1 %3742, %v2878_v61  }
  0x85   :  { %351 = vmatmul.mubr.f32.gmra.mxu0 %v102_v13 }
  0x86   :  { %2996 = vmatprep.mubr.msk.f32.mxu0 %vm108_vm0, %v105_v14 }
  0x89   :  { %356 = vmatmul.mubr.f32.gmra.mxu0 %v104_v15 }
  0x8a   :  { %2997 = vmatprep.mubr.msk.f32.mxu0 %vm108_vm0, %v107_v16 }
  0x8d   :  { %361 = vmatmul.mubr.f32.gmra.mxu0 %v106_v17 }
  0xac   :  { %v476_v53 = vpop.permute.xlu0 %475 }
  0xad   :  { %v466_v55 = vpop.permute.xlu1 %465 }
  0xb0   :  { %v471_v57 = vpop.permute.xlu0 %470 }
  0xb1   :  { %v461_v59 = vpop.permute.xlu1 %460 }
  0xb4   :  { %v456_v61 = vpop.permute.xlu0 %455 }
  0xf1   :  { %v247_v60 = vpop.f32.mrf.mxu0 }
  0xf2   :  { %3448 = vmatprep.mubr.msk.f32.mxu1 %vm108_vm0, %v247_v60 }
  0xf3   :  { %v249_v62 = vpop.f32.mrf.mxu0 }
  0xf5   :  { %v252_v63 = vpop.f32.mrf.mxu0 }
  0xf6   :  { %3449 = vmatmul.mubr.msk.f32.vlgmr.msra.gmra.mxu1 %vm108_vm0, %v252_v63  ;;  %v451_v63 = vpop.permute.xlu1 %450 }
  0xf7   :  { %v254_v0 = vpop.f32.mrf.mxu0 }
  0xf9   :  { %v257_v2 = vpop.f32.mrf.mxu0 }
  0xfa   :  { %3451 = vmatprep.mubr.msk.f32.mxu1 %vm108_vm0, %v257_v2  ;;  %v446_v2 = vpop.permute.xlu0 %445 }
  0xfb   :  { %v259_v3 = vpop.f32.mrf.mxu0 }
  0xfd   :  { %v262_v4 = vpop.f32.mrf.mxu0 }
  0xfe   :  { %3452 = vmatmul.mubr.msk.f32.gmra.mxu1 %vm108_vm0, %v262_v4  ;;  %v441_v4 = vpop.permute.xlu1 %440 }
  0xff   :  { %v264_v5 = vpop.f32.mrf.mxu0 }
 0x101   :  { %v267_v6 = vpop.f32.mrf.mxu0 }
 0x102   :  { %3454 = vmatprep.mubr.msk.f32.mxu1 %vm108_vm0, %v267_v6  ;;  %v436_v6 = vpop.permute.xlu0 %435 }
 0x103   :  { %v269_v7 = vpop.f32.mrf.mxu0 }
 0x105   :  { %v272_v8 = vpop.f32.mrf.mxu0 }
 0x106   :  { %3455 = vmatmul.mubr.msk.f32.gmra.mxu1 %vm108_vm0, %v272_v8  ;;  %v431_v8 = vpop.permute.xlu1 %430 }
 0x107   :  { %v274_v9 = vpop.f32.mrf.mxu0 }
 0x109   :  { %v277_v10 = vpop.f32.mrf.mxu0 }
 0x10a   :  { %3457 = vmatprep.mubr.msk.f32.mxu1 %vm108_vm0, %v277_v10 }
 0x10b   :  { %v279_v11 = vpop.f32.mrf.mxu0 }
 0x10d   :  { %v282_v12 = vpop.f32.mrf.mxu0 }
 0x10e   :  { %3458 = vmatmul.mubr.msk.f32.gmra.mxu1 %vm108_vm0, %v282_v12 }
 0x10f   :  { %v284_v13 = vpop.f32.mrf.mxu0 }
 0x111   :  { %v287_v14 = vpop.f32.mrf.mxu0 }
 0x112   :  { %3460 = vmatprep.mubr.msk.f32.mxu1 %vm108_vm0, %v287_v14 }
 0x113   :  { %v289_v15 = vpop.f32.mrf.mxu0 }
 0x114   :  { %v426_v15 = vpop.permute.xlu0 %425 }
 0x115   :  { %v292_v16 = vpop.f32.mrf.mxu0 }
 0x116   :  { %3461 = vmatmul.mubr.msk.f32.gmra.mxu1 %vm108_vm0, %v292_v16 }
 0x117   :  { %v294_v17 = vpop.f32.mrf.mxu0 }
 0x119   :  { %v297_v18 = vpop.f32.mrf.mxu0 }
 0x11a   :  { %3463 = vmatprep.mubr.msk.f32.mxu1 %vm108_vm0, %v297_v18 }
 0x11b   :  { %v299_v19 = vpop.f32.mrf.mxu0 }
 0x11d   :  { %v302_v20 = vpop.f32.mrf.mxu0 }
 0x11e   :  { %3464 = vmatmul.mubr.msk.f32.gmra.mxu1 %vm108_vm0, %v302_v20  ;;  %v421_v20 = vpop.permute.xlu1 %420 }
 0x11f   :  { %v304_v21 = vpop.f32.mrf.mxu0 }
 0x121   :  { %v307_v22 = vpop.f32.mrf.mxu0 }
 0x122   :  { %3466 = vmatprep.mubr.msk.f32.mxu1 %vm108_vm0, %v307_v22 }
 0x123   :  { %v309_v23 = vpop.f32.mrf.mxu0 }
 0x125   :  { %v312_v24 = vpop.f32.mrf.mxu0 }
 0x126   :  { %3467 = vmatmul.mubr.msk.f32.gmra.mxu1 %vm108_vm0, %v312_v24 }
 0x127   :  { %v314_v25 = vpop.f32.mrf.mxu0 }
 0x129   :  { %v317_v26 = vpop.f32.mrf.mxu0 }
 0x12a   :  { %3469 = vmatprep.mubr.msk.f32.mxu1 %vm108_vm0, %v317_v26 }
 0x12b   :  { %v319_v27 = vpop.f32.mrf.mxu0 }
 0x12d   :  { %v322_v28 = vpop.f32.mrf.mxu0 }
 0x12e   :  { %3470 = vmatmul.mubr.msk.f32.gmra.mxu1 %vm108_vm0, %v322_v28  ;;  %v416_v28 = vpop.permute.xlu0 %415 }
 0x12f   :  { %v324_v29 = vpop.f32.mrf.mxu0 }
 0x131   :  { %v327_v30 = vpop.f32.mrf.mxu0 }
 0x132   :  { %3472 = vmatprep.mubr.msk.f32.mxu1 %vm108_vm0, %v327_v30 }
 0x133   :  { %v329_v31 = vpop.f32.mrf.mxu0 }
 0x134   :  { %v411_v31 = vpop.permute.xlu1 %410 }
 0x135   :  { %v332_v32 = vpop.f32.mrf.mxu0 }
 0x136   :  { %3473 = vmatmul.mubr.msk.f32.gmra.mxu1 %vm108_vm0, %v332_v32 }
 0x137   :  { %v334_v33 = vpop.f32.mrf.mxu0 }
 0x139   :  { %v337_v34 = vpop.f32.mrf.mxu0 }
 0x13a   :  { %3475 = vmatprep.mubr.msk.f32.mxu1 %vm108_vm0, %v337_v34 }
 0x13b   :  { %v339_v35 = vpop.f32.mrf.mxu0 }
 0x13d   :  { %v342_v36 = vpop.f32.mrf.mxu0 }
 0x13e   :  { %3476 = vmatmul.mubr.msk.f32.gmra.mxu1 %vm108_vm0, %v342_v36  ;;  %v406_v36 = vpop.permute.xlu0 %405 }
 0x13f   :  { %v344_v37 = vpop.f32.mrf.mxu0 }
 0x141   :  { %v347_v38 = vpop.f32.mrf.mxu0 }
 0x142   :  { %3478 = vmatprep.mubr.msk.f32.mxu1 %vm108_vm0, %v347_v38 }
 0x143   :  { %v349_v39 = vpop.f32.mrf.mxu0 }
 0x144   :  { %v401_v39 = vpop.permute.xlu1 %400 }
 0x145   :  { %v352_v40 = vpop.f32.mrf.mxu0 }
 0x146   :  { %3479 = vmatmul.mubr.msk.f32.gmra.mxu1 %vm108_vm0, %v352_v40 }
 0x147   :  { %v354_v41 = vpop.f32.mrf.mxu0 }
 0x149   :  { %v357_v42 = vpop.f32.mrf.mxu0 }
 0x14a   :  { %3481 = vmatprep.mubr.msk.f32.mxu1 %vm108_vm0, %v357_v42 }
 0x14b   :  { %v359_v43 = vpop.f32.mrf.mxu0 }
 0x14d   :  { %v362_v44 = vpop.f32.mrf.mxu0 }
 0x14e   :  { %3482 = vmatmul.mubr.msk.f32.gmra.mxu1 %vm108_vm0, %v362_v44 }
 0x14f   :  { %v364_v45 = vpop.f32.mrf.mxu0  ;;  %3046 = vmatprep.mubr.msk.f32.mxu1 %vm108_vm0, %v920_v46 }
 0x150   :  { %v516_v45 = vpop.permute.xlu0 %515 }
 0x1b6   :  { %v4436_v47 = vpop.f32.mrf.mxu1 }
 0x1b8   :  { %v4438_v48 = vpop.f32.mrf.mxu1 }
 0x1be   :  { %v4440_v49 = vpop.f32.mrf.mxu1 }
 0x1bf   :  { %v672_v40 = vadd.f32 %v4440_v49, %v416_v28 }
 0x1c0   :  { %v4442_v50 = vpop.f32.mrf.mxu1 }
 0x1c1   :  { %v667_v46 = vadd.f32 %v4442_v50, %v411_v31 }
 0x1c6   :  { %v3456_v51 = vpop.f32.mrf.mxu1 }
 0x1c7   :  { %v682_v35 = vadd.f32 %v3456_v51, %v426_v15 }
 0x1c8   :  { %v676_v52 = vpop.f32.mrf.mxu1 }
 0x1c9   :  { %v677_v37 = vadd.f32 %v676_v52, %v421_v20  ;;  %v3027_v41 = vmul.f32 -1.442695, %v682_v35  ;;  %v662_v52 = vadd.f32 %v4436_v47, %v406_v36 }
 0x1ce   :  { %v3459_v54 = vpop.f32.mrf.mxu1 }
 0x1cf   :  { %v692_v21 = vadd.f32 %v3459_v54, %v436_v6 }
 0x1d0   :  { %v686_v56 = vpop.f32.mrf.mxu1 }
 0x1d1   :  { %v687_v25 = vadd.f32 %v686_v56, %v431_v8  ;;  %v3029_v29 = vmul.f32 -1.442695, %v692_v21  ;;  %v3025_v56 = vmul.f32 -1.442695, %v672_v40 }
 0x1d3   :  { %v3028_v32 = vmul.f32 -1.442695, %v687_v25 }
 0x1d6   :  { %v3462_v58 = vpop.f32.mrf.mxu1 }
 0x1d7   :  { %v702_v23 = vadd.f32 %v3462_v58, %v446_v2  ;;  %v3023_v2 = vmul.f32 -1.442695, %v662_v52 }
 0x1d8   :  { %v696_v60 = vpop.f32.mrf.mxu1 }
 0x1d9   :  { %v697_v26 = vadd.f32 %v696_v60, %v441_v4  ;;  %v3031_v30 = vmul.f32 -1.442695, %v702_v23 }
 0x1db   :  { %v3030_v33 = vmul.f32 -1.442695, %v697_v26 }
 0x1de   :  { %v3465_v62 = vpop.f32.mrf.mxu1 }
 0x1df   :  { %v712_v13 = vadd.f32 %v3465_v62, %v456_v61  ;;  %v657_v61 = vadd.f32 %v4438_v48, %v401_v39  ;;  %v3024_v62 = vmul.f32 -1.442695, %v667_v46 }
 0x1e0   :  { %v706_v0 = vpop.f32.mrf.mxu1 }
 0x1e1   :  { %v707_v19 = vadd.f32 %v706_v0, %v451_v63  ;;  %v3033_v24 = vmul.f32 -1.442695, %v712_v13  ;;  %v3022_v6 = vmul.f32 -1.442695, %v657_v61 }
 0x1e3   :  { %v3032_v27 = vmul.f32 -1.442695, %v707_v19 }
 0x1e6   :  { %v3468_v3 = vpop.f32.mrf.mxu1 }
 0x1e7   :  { %v722_v7 = vadd.f32 %v3468_v3, %v466_v55  ;;  %v506_v3 = vpop.permute.xlu0 %505 }
 0x1e8   :  { %v716_v5 = vpop.f32.mrf.mxu1 }
 0x1e9   :  { %v717_v9 = vadd.f32 %v716_v5, %v461_v59  ;;  %v3035_v11 = vmul.f32 -1.442695, %v722_v7 }
 0x1eb   :  { %v3034_v16 = vmul.f32 -1.442695, %v717_v9  ;;  %3743 = vpow2.f32 %v3035_v11 }
 0x1ee   :  { %v3471_v10 = vpop.f32.mrf.mxu1 }
 0x1ef   :  { %v732_v12 = vadd.f32 %v3471_v10, %v476_v53  ;;  %v3026_v53 = vmul.f32 -1.442695, %v677_v37 }
 0x1f0   :  { %v726_v14 = vpop.f32.mrf.mxu1 }
 0x1f1   :  { %v3037_v17 = vmul.f32 -1.442695, %v732_v12  ;;  %v727_v18 = vadd.f32 %v726_v14, %v471_v57  ;;  %v511_v57 = vpop.permute.xlu1 %510  ;;  %v496_v14 = vpop.permute.xlu0 %495 }
 0x1f3   :  { %v3036_v22 = vmul.f32 -1.442695, %v727_v18  ;;  %3745 = vpow2.f32 %v3037_v17 }
 0x1f4   :  { %3747 = vpow2.f32 %v3034_v16 }
 0x1f5   :  { %3749 = vpow2.f32 %v3036_v22  ;;  %v501_v7 = vpop.permute.xlu1 %500 }
 0x1f6   :  { %3751 = vpow2.f32 %v3033_v24  ;;  %v4444_v34 = vpop.f32.mrf.mxu1 }
 0x1f7   :  { %3753 = vpow2.f32 %v3032_v27 }
 0x1f8   :  { %3755 = vpow2.f32 %v3029_v29  ;;  %v4446_v38 = vpop.f32.mrf.mxu1  ;;  %v3744_v42 = vpop.eup %3743 }
 0x1f9   :  { %3757 = vpow2.f32 %v3031_v30  ;;  %v860_v58 = vadd.f32 1.0, %v3744_v42  ;;  %v491_v19 = vpop.permute.xlu1 %490 }
 0x1fa   :  { %3759 = vpow2.f32 %v3028_v32 }
 0x1fb   :  { %3761 = vpow2.f32 %v3030_v33  ;;  %v486_v33 = vpop.permute.xlu0 %485 }
 0x1fc   :  { %3763 = vpow2.f32 %v3027_v41  ;;  %v742_v37 = vadd.f32 %v4444_v34, %v486_v33  ;;  %v922_v33 = vld [vmem:[%s5275_s4 + $0x18] sm:$0xff] }
 0x1fd   :  { %v481_v42 = vpop.permute.xlu1 %480 }
 0x1fe   :  { %v3477_v43 = vpop.f32.mrf.mxu1 }
 0x1ff   :  { %v752_v23 = vadd.f32 %v3477_v43, %v496_v14 }
 0x200   :  { %v3746_v44 = vpop.eup %3745  ;;  %v746_v49 = vpop.f32.mrf.mxu1 }
 0x201   :  { %v3748_v51 = vpop.eup %3747  ;;  %v862_v54 = vadd.f32 1.0, %v3746_v44  ;;  %v747_v30 = vadd.f32 %v746_v49, %v491_v19  ;;  %v3041_v39 = vmul.f32 -1.442695, %v752_v23  ;;  %v737_v44 = vadd.f32 %v4446_v38, %v481_v42  ;;  %v3101_v49 = vld [vmem:[%s5276_s5 + $0x78] sm:$0xff]  ;;  %v928_v42 = vld [vmem:[%s5275_s4 + $0x48] sm:$0xff] }
 0x202   :  { %v3750_v55 = vpop.eup %3749  ;;  %v859_v63 = vadd.f32 1.0, %v3748_v51  ;;  %v3039_v51 = vmul.f32 -1.442695, %v742_v37  ;;  %3484 = vmatprep.subr.mxu0 %v3101_v49  ;;  %v923_v37 = vld [vmem:[%s5275_s4 + $0x20] sm:$0xff] }
 0x203   :  { %3765 = vrcp.f32 %v862_v54  ;;  %v861_v59 = vadd.f32 1.0, %v3750_v55  ;;  %v3752_v60 = vpop.eup %3751  ;;  %v3038_v52 = vmul.f32 -1.442695, %v737_v44  ;;  %3485 = vmatpush3.msra.mxu0 %v3101_v49  ;;  %v930_v44 = vld [vmem:[%s5275_s4 + $0x58] sm:$0xff]  ;;  %v937_v49 = vld [vmem:[%s5275_s4 + $0x90] sm:$0xff] }
 0x204   :  { %3767 = vpow2.f32 %v3026_v53  ;;  %v3754_v0 = vpop.eup %3753  ;;  %v858_v4 = vadd.f32 1.0, %v3752_v60  ;;  %v3100_v60 = vld [vmem:[%s5276_s5 + $0x70] sm:$0xff] }
 0x205   :  { %3769 = vrcp.f32 %v861_v59  ;;  %v3756_v47 = vpop.eup %3755  ;;  %v857_v9 = vadd.f32 1.0, %v3754_v0  ;;  %3486 = vmatprep.subr.mxu0 %v3100_v60 }
 0x206   :  { %v3480_v50 = vpop.f32.mrf.mxu1  ;;  %3771 = vpow2.f32 %v3025_v56  ;;  %v3758_v5 = vpop.eup %3757  ;;  %v854_v11 = vadd.f32 1.0, %v3756_v47  ;;  %3487 = vmatpush3.msra.mxu0 %v3100_v60  ;;  %v940_v60 = vld [vmem:[%s5275_s4 + $0xa8] sm:$0xff] }
 0x207   :  { %3773 = vrcp.f32 %v860_v58  ;;  %v3760_v8 = vpop.eup %3759  ;;  %v762_v12 = vadd.f32 %v3480_v50, %v506_v3  ;;  %v856_v13 = vadd.f32 1.0, %v3758_v5  ;;  %v3099_v50 = vld [vmem:[%s5276_s5 + $0x68] sm:$0xff]  ;;  %v3098_v3 = vld [vmem:[%s5276_s5 + $0x60] sm:$0xff] }
 0x208   :  { %3775 = vpow2.f32 %v3024_v62  ;;  %v756_v48 = vpop.f32.mrf.mxu1  ;;  %v3762_v10 = vpop.eup %3761  ;;  %v853_v15 = vadd.f32 1.0, %v3760_v8  ;;  %3488 = vmatprep.subr.mxu0 %v3099_v50 }
 0x209   :  { %3777 = vrcp.f32 %v859_v63  ;;  %v757_v16 = vadd.f32 %v756_v48, %v501_v7  ;;  %v855_v17 = vadd.f32 1.0, %v3762_v10  ;;  %v3043_v20 = vmul.f32 -1.442695, %v762_v12  ;;  %v3764_v22 = vpop.eup %3763  ;;  %3489 = vmatpush3.msra.mxu0 %v3099_v50  ;;  %v942_v50 = vld [vmem:[%s5275_s4 + $0xb8] sm:$0xff] }
 0x20a   :  { %3779 = vpow2.f32 %v3023_v2  ;;  %v852_v32 = vadd.f32 1.0, %v3764_v22  ;;  %3490 = vmatprep.subr.mxu0 %v3098_v3 }
 0x20b   :  { %3781 = vrcp.f32 %v858_v4  ;;  %v3042_v26 = vmul.f32 -1.442695, %v757_v16  ;;  %3491 = vmatpush3.msra.mxu0 %v3098_v3  ;;  %v3058_v3 = vld [vmem:[%s5275_s4 + $0xc0] sm:$0xff] }
 0x20c   :  { %3783 = vpow2.f32 %v3022_v6 }
 0x20d   :  { %3785 = vrcp.f32 %v857_v9 }
 0x20e   :  { %v3483_v18 = vpop.f32.mrf.mxu1  ;;  %3787 = vrcp.f32 %v854_v11 }
 0x20f   :  { %v772_v21 = vadd.f32 %v3483_v18, %v516_v45  ;;  %3789 = vrcp.f32 %v856_v13  ;;  %v3040_v45 = vmul.f32 -1.442695, %v747_v30  ;;  %v919_v30 = vld [vmem:[%s5275_s4] sm:$0xff] }
 0x210   :  { %v766_v24 = vpop.f32.mrf.mxu1  ;;  %v4452_v25 = vpop.eup %3765  ;;  %3791 = vrcp.f32 %v853_v15 }
 0x211   :  { %v3045_v27 = vmul.f32 -1.442695, %v772_v21  ;;  %v767_v28 = vadd.f32 %v766_v24, %v511_v57  ;;  %v3768_v29 = vpop.eup %3767  ;;  %3793 = vrcp.f32 %v855_v17  ;;  %980 = vmatpush1.msra.mxu1 %v4452_v25 }
 0x212   :  { %v4455_v31 = vpop.eup %3769  ;;  %3795 = vpow2.f32 %v3043_v20  ;;  %981 = vmatprep.subr.mxu1 %v3933_v1  ;;  %v851_v41 = vadd.f32 1.0, %v3768_v29 }
 0x213   :  { %v3044_v35 = vmul.f32 -1.442695, %v767_v28  ;;  %v3772_v36 = vpop.eup %3771  ;;  %3797 = vpow2.f32 %v3045_v27  ;;  %982 = vmatpush1.msra.mxu1 %v4455_v31 }
 0x214   :  { %v4460_v40 = vpop.eup %3773  ;;  %3799 = vpow2.f32 %v3042_v26  ;;  %983 = vmatprep.subr.mxu1 %v3933_v1  ;;  %v850_v34 = vadd.f32 1.0, %v3772_v36  ;;  %v924_v36 = vld [vmem:[%s5275_s4 + $0x28] sm:$0xff] }
 0x215   :  { %v3776_v43 = vpop.eup %3775  ;;  %3801 = vpow2.f32 %v3044_v35  ;;  %984 = vmatpush1.msra.mxu1 %v4460_v40  ;;  %v921_v35 = vld [vmem:[%s5275_s4 + $0x10] sm:$0xff] }
 0x216   :  { %v4465_v46 = vpop.eup %3777  ;;  %3803 = vrcp.f32 %v852_v32  ;;  %985 = vmatprep.subr.mxu1 %v3933_v1  ;;  %v849_v55 = vadd.f32 1.0, %v3776_v43  ;;  %v927_v43 = vld [vmem:[%s5275_s4 + $0x40] sm:$0xff] }
 0x217   :  { %v3780_v53 = vpop.eup %3779  ;;  %3805 = vpow2.f32 %v3041_v39  ;;  %986 = vmatpush1.msra.mxu1 %v4465_v46  ;;  %v926_v39 = vld [vmem:[%s5275_s4 + $0x38] sm:$0xff] }
 0x218   :  { %v4469_v54 = vpop.eup %3781  ;;  %3807 = vrcp.f32 %v851_v41  ;;  %987 = vmatprep.subr.mxu1 %v3933_v1  ;;  %v848_v58 = vadd.f32 1.0, %v3780_v53  ;;  %v925_v41 = vld [vmem:[%s5275_s4 + $0x30] sm:$0xff]  ;;  %v931_v53 = vld [vmem:[%s5275_s4 + $0x60] sm:$0xff] }
 0x219   :  { %v3784_v38 = vpop.eup %3783  ;;  %3809 = vpow2.f32 %v3040_v45  ;;  %988 = vmatpush1.msra.mxu1 %v4469_v54  ;;  %v929_v45 = vld [vmem:[%s5275_s4 + $0x50] sm:$0xff] }
 0x21a   :  { %v4473_v56 = vpop.eup %3785  ;;  %3811 = vrcp.f32 %v850_v34  ;;  %989 = vmatprep.subr.mxu1 %v3933_v1  ;;  %v847_v62 = vadd.f32 1.0, %v3784_v38  ;;  %v932_v34 = vld [vmem:[%s5275_s4 + $0x68] sm:$0xff] }
 0x21b   :  { %v4476_v57 = vpop.eup %3787  ;;  %3813 = vpow2.f32 %v3039_v51  ;;  %990 = vmatpush1.msra.mxu1 %v4473_v56  ;;  %v934_v51 = vld [vmem:[%s5275_s4 + $0x78] sm:$0xff]  ;;  %v936_v38 = vld [vmem:[%s5275_s4 + $0x88] sm:$0xff] }
 0x21c   :  { %v4479_v59 = vpop.eup %3789  ;;  %3815 = vrcp.f32 %v849_v55  ;;  %991 = vmatprep.subr.mxu1 %v3933_v1  ;;  %v933_v55 = vld [vmem:[%s5275_s4 + $0x70] sm:$0xff] }
 0x21d   :  { %v4488_v61 = vpop.eup %3791  ;;  %3817 = vpow2.f32 %v3038_v52  ;;  %992 = vmatpush1.msra.mxu1 %v4479_v59  ;;  %v935_v52 = vld [vmem:[%s5275_s4 + $0x80] sm:$0xff] }
 0x21e   :  { %v4491_v63 = vpop.eup %3793  ;;  %993 = vmatprep.subr.mxu1 %v3933_v1  ;;  %3819 = vrcp.f32 %v848_v58  ;;  %v938_v58 = vld [vmem:[%s5275_s4 + $0x98] sm:$0xff] }
 0x21f   :  { %v3796_v0 = vpop.eup %3795  ;;  %994 = vmatpush1.msra.mxu1 %v4491_v63  ;;  %3821 = vrcp.f32 %v847_v62  ;;  %v939_v62 = vld [vmem:[%s5275_s4 + $0xa0] sm:$0xff] }
 0x220   :  { %v3798_v2 = vpop.eup %3797  ;;  %995 = vmatprep.subr.mxu1 %v3933_v1  ;;  %v868_v7 = vadd.f32 1.0, %v3796_v0  ;;  %v941_v0 = vld [vmem:[%s5275_s4 + $0xb0] sm:$0xff] }
 0x221   :  { %v3800_v47 = vpop.eup %3799  ;;  %v870_v4 = vadd.f32 1.0, %v3798_v2  ;;  %996 = vmatpush1.msra.mxu1 %v4476_v57  ;;  %v3059_v2 = vld [vmem:[%s5275_s4 + $0xc8] sm:$0xff] }
 0x222   :  { %v3802_v5 = vpop.eup %3801  ;;  %997 = vmatprep.subr.mxu1 %v3933_v1  ;;  %v867_v10 = vadd.f32 1.0, %v3800_v47  ;;  %v1111_v47 = vld [vmem:[%s5276_s5 + $0x38] sm:$0xff] }
 0x223   :  { %v4504_v6 = vpop.eup %3803  ;;  %3823 = vrcp.f32 %v870_v4  ;;  %v869_v8 = vadd.f32 1.0, %v3802_v5  ;;  %998 = vmatpush1.msra.mxu1 %v4488_v61  ;;  %v3061_v4 = vld [vmem:[%s5275_s4 + $0xd8] sm:$0xff]  ;;  %v1110_v5 = vld [vmem:[%s5276_s5 + $0x30] sm:$0xff] }
 0x224   :  { %v3806_v9 = vpop.eup %3805  ;;  %999 = vmatprep.subr.mxu1 %v3933_v1 }
 0x225   :  { %v4508_v48 = vpop.eup %3807  ;;  %3825 = vrcp.f32 %v869_v8  ;;  %1000 = vmatpush1.msra.mxu1 %v4504_v6  ;;  %v866_v13 = vadd.f32 1.0, %v3806_v9  ;;  %v1109_v8 = vld [vmem:[%s5276_s5 + $0x28] sm:$0xff] }
 0x226   :  { %v3810_v11 = vpop.eup %3809  ;;  %1001 = vmatprep.subr.mxu1 %v3933_v1  ;;  %3827 = vrcp.f32 %v868_v7  ;;  %v3060_v7 = vld [vmem:[%s5275_s4 + $0xd0] sm:$0xff]  ;;  %v3063_v9 = vld [vmem:[%s5275_s4 + $0xe8] sm:$0xff] }
 0x227   :  { %v4512_v12 = vpop.eup %3811  ;;  %1002 = vmatpush1.msra.mxu1 %v4508_v48  ;;  %v865_v16 = vadd.f32 1.0, %v3810_v11  ;;  %3829 = vrcp.f32 %v867_v10  ;;  %v1108_v10 = vld [vmem:[%s5276_s5 + $0x20] sm:$0xff] }
 0x228   :  { %v3814_v14 = vpop.eup %3813  ;;  %1003 = vmatprep.subr.mxu1 %v3933_v1  ;;  %3831 = vrcp.f32 %v866_v13  ;;  %v3062_v11 = vld [vmem:[%s5275_s4 + $0xe0] sm:$0xff]  ;;  %v1107_v13 = vld [vmem:[%s5276_s5 + $0x18] sm:$0xff] }
 0x229   :  { %v4516_v15 = vpop.eup %3815  ;;  %1004 = vmatpush1.msra.mxu1 %v4512_v12  ;;  %v864_v18 = vadd.f32 1.0, %v3814_v14  ;;  %3833 = vrcp.f32 %v865_v16  ;;  %v3065_v14 = vld [vmem:[%s5275_s4 + $0xf8] sm:$0xff]  ;;  %v1106_v16 = vld [vmem:[%s5276_s5 + $0x10] sm:$0xff] }
 0x22a   :  { %v3818_v17 = vpop.eup %3817  ;;  %1005 = vmatprep.subr.mxu1 %v3933_v1 }
 0x22b   :  { %1006 = vmatpush1.msra.mxu1 %v4516_v15  ;;  %v4521_v19 = vpop.eup %3819  ;;  %v863_v20 = vadd.f32 1.0, %v3818_v17  ;;  %3835 = vrcp.f32 %v864_v18  ;;  %v3064_v17 = vld [vmem:[%s5275_s4 + $0xf0] sm:$0xff]  ;;  %v3067_v18 = vld [vmem:[%s5275_s4 + $0x108] sm:$0xff] }
 0x22c   :  { %1007 = vmatprep.subr.mxu1 %v3933_v1  ;;  %v4525_v21 = vpop.eup %3821 }
 0x22d   :  { %1008 = vmatpush1.msra.mxu1 %v4521_v19  ;;  %3837 = vrcp.f32 %v863_v20  ;;  %v3066_v20 = vld [vmem:[%s5275_s4 + $0x100] sm:$0xff] }
 0x22e   :  { %1009 = vmatprep.subr.mxu1 %v3933_v1 }
 0x22f   :  { %1010 = vmatpush1.msra.mxu1 %v4525_v21 }
 0x230   :  { %v4529_v22 = vpop.eup %3823  ;;  %1027 = vmatprep.subr.mxu1 %v3933_v1 }
 0x231   :  { %1028 = vmatpush2.msra.mxu1 %v4529_v22 }
 0x232   :  { %v4533_v23 = vpop.eup %3825  ;;  %1029 = vmatprep.subr.mxu1 %v3933_v1 }
 0x233   :  { %1030 = vmatpush2.msra.mxu1 %v4533_v23  ;;  %v4537_v24 = vpop.eup %3827 }
 0x234   :  { %1031 = vmatprep.subr.mxu1 %v3933_v1  ;;  %v4541_v26 = vpop.eup %3829 }
 0x235   :  { %1032 = vmatpush2.msra.mxu1 %v4537_v24  ;;  %v4545_v27 = vpop.eup %3831 }
 0x236   :  { %1033 = vmatprep.subr.mxu1 %v3933_v1  ;;  %v4549_v28 = vpop.eup %3833 }
 0x237   :  { %1034 = vmatpush2.msra.mxu1 %v4541_v26 }
 0x238   :  { %1035 = vmatprep.subr.mxu1 %v3933_v1  ;;  %v4553_v29 = vpop.eup %3835 }
 0x239   :  { %1036 = vmatpush2.msra.mxu1 %v4545_v27 }
 0x23a   :  { %1037 = vmatprep.subr.mxu1 %v3933_v1  ;;  %v4560_v32 = vpop.eup %3837 }
 0x23b   :  { %1038 = vmatpush2.msra.mxu1 %v4549_v28 }
 0x23c   :  { %1039 = vmatprep.subr.mxu1 %v3933_v1 }
 0x23d   :  { %1040 = vmatpush2.msra.mxu1 %v4553_v29 }
 0x23e   :  { %1041 = vmatprep.subr.mxu1 %v3933_v1 }
 0x23f   :  { %1042 = vmatpush2.msra.mxu1 %v4560_v32 }
 0x240   :  { %1044 = vmatmul.mubr.f32.vlgmr.msra.gmra.mxu1 %v919_v30  ;;  %1173 = vmatprep.subr.mxu1 %v3933_v1  ;;  %v3069_v30 = vld [vmem:[%s5275_s4 + $0x118] sm:$0xff] }
 0x241   :  { %1174 = vmatpush1.msra.mxu1 %v4452_v25  ;;  %3047 = vmatprep.mubr.msk.f32.mxu1 %vm108_vm0, %v922_v33  ;;  %v1105_v33 = vld [vmem:[%s5276_s5 + $0x8] sm:$0xff] }
 0x242   :  { %1175 = vmatprep.subr.mxu1 %v3933_v1 }
 0x243   :  { %1176 = vmatpush1.msra.mxu1 %v4455_v31 }
 0x244   :  { %1049 = vmatmul.mubr.f32.gmra.mxu1 %v921_v35  ;;  %1177 = vmatprep.subr.mxu1 %v3933_v1  ;;  %v3068_v35 = vld [vmem:[%s5275_s4 + $0x110] sm:$0xff] }
 0x245   :  { %1178 = vmatpush1.msra.mxu1 %v4460_v40  ;;  %3048 = vmatprep.mubr.msk.f32.mxu1 %vm108_vm0, %v924_v36  ;;  %v3071_v36 = vld [vmem:[%s5275_s4 + $0x128] sm:$0xff] }
 0x246   :  { %1179 = vmatprep.subr.mxu1 %v3933_v1 }
 0x247   :  { %1180 = vmatpush1.msra.mxu1 %v4465_v46 }
 0x248   :  { %1054 = vmatmul.mubr.f32.gmra.mxu1 %v923_v37  ;;  %1181 = vmatprep.subr.mxu1 %v3933_v1  ;;  %v1104_v37 = vld [vmem:[%s5276_s5] sm:$0xff] }
 0x249   :  { %1182 = vmatpush1.msra.mxu1 %v4469_v54  ;;  %3049 = vmatprep.mubr.msk.f32.mxu1 %vm108_vm0, %v926_v39  ;;  %v3097_v39 = vld [vmem:[%s5276_s5 + $0x58] sm:$0xff] }
 0x24a   :  { %1183 = vmatprep.subr.mxu1 %v3933_v1  ;;  %3492 = vmatprep.subr.mxu0 %v3097_v39 }
 0x24b   :  { %1184 = vmatpush1.msra.mxu1 %v4473_v56  ;;  %3493 = vmatpush3.msra.mxu0 %v3097_v39 }
 0x24c   :  { %1059 = vmatmul.mubr.f32.gmra.mxu1 %v925_v41  ;;  %1185 = vmatprep.subr.mxu1 %v3933_v1  ;;  %v3070_v41 = vld [vmem:[%s5275_s4 + $0x120] sm:$0xff] }
 0x24d   :  { %1186 = vmatpush1.msra.mxu1 %v4479_v59  ;;  %3050 = vmatprep.mubr.msk.f32.mxu1 %vm108_vm0, %v928_v42  ;;  %v3073_v42 = vld [vmem:[%s5275_s4 + $0x138] sm:$0xff] }
 0x24e   :  { %1187 = vmatprep.subr.mxu1 %v3933_v1 }
 0x24f   :  { %1188 = vmatpush1.msra.mxu1 %v4491_v63 }
 0x250   :  { %1064 = vmatmul.mubr.f32.gmra.mxu1 %v927_v43  ;;  %1189 = vmatprep.subr.mxu1 %v3933_v1  ;;  %v3072_v43 = vld [vmem:[%s5275_s4 + $0x130] sm:$0xff] }
 0x251   :  { %1190 = vmatpush1.msra.mxu1 %v4476_v57  ;;  %3051 = vmatprep.mubr.msk.f32.mxu1 %vm108_vm0, %v930_v44  ;;  %v3075_v44 = vld [vmem:[%s5275_s4 + $0x148] sm:$0xff] }
 0x252   :  { %1191 = vmatprep.subr.mxu1 %v3933_v1 }
 0x253   :  { %1192 = vmatpush1.msra.mxu1 %v4488_v61 }
 0x254   :  { %1069 = vmatmul.mubr.f32.gmra.mxu1 %v929_v45  ;;  %1193 = vmatprep.subr.mxu1 %v3933_v1  ;;  %v3074_v45 = vld [vmem:[%s5275_s4 + $0x140] sm:$0xff] }
 0x255   :  { %1194 = vmatpush1.msra.mxu1 %v4504_v6  ;;  %3052 = vmatprep.mubr.msk.f32.mxu1 %vm108_vm0, %v932_v34  ;;  %v3077_v34 = vld [vmem:[%s5275_s4 + $0x158] sm:$0xff] }
 0x256   :  { %1195 = vmatprep.subr.mxu1 %v3933_v1 }
 0x257   :  { %1196 = vmatpush1.msra.mxu1 %v4508_v48 }
 0x258   :  { %1074 = vmatmul.mubr.f32.gmra.mxu1 %v931_v53  ;;  %1197 = vmatprep.subr.mxu1 %v3933_v1  ;;  %v3096_v53 = vld [vmem:[%s5276_s5 + $0x50] sm:$0xff] }
 0x259   :  { %1198 = vmatpush1.msra.mxu1 %v4512_v12  ;;  %3053 = vmatprep.mubr.msk.f32.mxu1 %vm108_vm0, %v934_v51  ;;  %v3076_v51 = vld [vmem:[%s5275_s4 + $0x150] sm:$0xff] }
 0x25a   :  { %1199 = vmatprep.subr.mxu1 %v3933_v1  ;;  %3494 = vmatprep.subr.mxu0 %v3096_v53 }
 0x25b   :  { %1200 = vmatpush1.msra.mxu1 %v4516_v15  ;;  %3495 = vmatpush3.msra.mxu0 %v3096_v53  ;;  %v3135_v53 = vld [vmem:[%s5275_s4 + $0x1c8] sm:$0xff] }
 0x25c   :  { %1079 = vmatmul.mubr.f32.gmra.mxu1 %v933_v55  ;;  %1201 = vmatprep.subr.mxu1 %v3933_v1  ;;  %v3079_v55 = vld [vmem:[%s5275_s4 + $0x168] sm:$0xff] }
 0x25d   :  { %1202 = vmatpush1.msra.mxu1 %v4521_v19  ;;  %3054 = vmatprep.mubr.msk.f32.mxu1 %vm108_vm0, %v936_v38  ;;  %v3078_v38 = vld [vmem:[%s5275_s4 + $0x160] sm:$0xff] }
 0x25e   :  { %1203 = vmatprep.subr.mxu1 %v3933_v1 }
 0x25f   :  { %1204 = vmatpush1.msra.mxu1 %v4525_v21 }
 0x260   :  { %1084 = vmatmul.mubr.f32.gmra.mxu1 %v935_v52  ;;  %1221 = vmatprep.subr.mxu1 %v3933_v1  ;;  %v3081_v52 = vld [vmem:[%s5275_s4 + $0x178] sm:$0xff] }
 0x261   :  { %1222 = vmatpush2.msra.mxu1 %v4529_v22  ;;  %3055 = vmatprep.mubr.msk.f32.mxu1 %vm108_vm0, %v938_v58  ;;  %v3080_v58 = vld [vmem:[%s5275_s4 + $0x170] sm:$0xff] }
 0x262   :  { %1223 = vmatprep.subr.mxu1 %v3933_v1 }
 0x263   :  { %1224 = vmatpush2.msra.mxu1 %v4533_v23 }
 0x264   :  { %1089 = vmatmul.mubr.f32.gmra.mxu1 %v937_v49  ;;  %1225 = vmatprep.subr.mxu1 %v3933_v1  ;;  %v3095_v49 = vld [vmem:[%s5276_s5 + $0x48] sm:$0xff] }
 0x265   :  { %1226 = vmatpush2.msra.mxu1 %v4537_v24  ;;  %3056 = vmatprep.mubr.msk.f32.mxu1 %vm108_vm0, %v940_v60  ;;  %v3094_v60 = vld [vmem:[%s5276_s5 + $0x40] sm:$0xff] }
 0x266   :  { %1227 = vmatprep.subr.mxu1 %v3933_v1  ;;  %3496 = vmatprep.subr.mxu0 %v3095_v49 }
 0x267   :  { %1228 = vmatpush2.msra.mxu1 %v4541_v26  ;;  %3497 = vmatpush3.msra.mxu0 %v3095_v49  ;;  %v3141_v49 = vld [vmem:[%s5275_s4 + $0x1f8] sm:$0xff] }
 0x268   :  { %1094 = vmatmul.mubr.f32.gmra.mxu1 %v939_v62  ;;  %1229 = vmatprep.subr.mxu1 %v3933_v1 }
 0x269   :  { %1230 = vmatpush2.msra.mxu1 %v4545_v27  ;;  %3057 = vmatprep.mubr.msk.f32.mxu1 %vm108_vm0, %v942_v50 }
 0x26a   :  { %1231 = vmatprep.subr.mxu1 %v3933_v1  ;;  %3498 = vmatprep.subr.mxu0 %v3094_v60 }
 0x26b   :  { %1232 = vmatpush2.msra.mxu1 %v4549_v28  ;;  %3499 = vmatpush3.msra.mxu0 %v3094_v60  ;;  %v3140_v60 = vld [vmem:[%s5275_s4 + $0x1f0] sm:$0xff] }
 0x26c   :  { %1099 = vmatmul.mubr.f32.gmra.mxu1 %v941_v0  ;;  %1233 = vmatprep.subr.mxu1 %v3933_v1 }
 0x26d   :  { %1234 = vmatpush2.msra.mxu1 %v4553_v29  ;;  %3082 = vmatprep.mubr.msk.f32.mxu1 %vm108_vm0, %v3059_v2 }
 0x26e   :  { %1235 = vmatprep.subr.mxu1 %v3933_v1  ;;  %1690 = vmatprep.subr.mxu0 %v3933_v1 }
 0x26f   :  { %1236 = vmatpush2.msra.mxu1 %v4560_v32 }
 0x270   :  { %1238 = vmatmul.mubr.f32.vlgmr.msra.gmra.mxu1 %v3058_v3  ;;  %3518 = vmatprep.subr.mxu1 %v1111_v47 }
 0x271   :  { %3083 = vmatprep.mubr.msk.f32.mxu1 %vm108_vm0, %v3061_v4  ;;  %3519 = vmatpush3.msra.mxu1 %v1111_v47 }
 0x272   :  { %3520 = vmatprep.subr.mxu1 %v1110_v5 }
 0x273   :  { %3521 = vmatpush3.msra.mxu1 %v1110_v5 }
 0x274   :  { %1243 = vmatmul.mubr.f32.gmra.mxu1 %v3060_v7  ;;  %3522 = vmatprep.subr.mxu1 %v1109_v8 }
 0x275   :  { %3084 = vmatprep.mubr.msk.f32.mxu1 %vm108_vm0, %v3063_v9  ;;  %3523 = vmatpush3.msra.mxu1 %v1109_v8 }
 0x276   :  { %3524 = vmatprep.subr.mxu1 %v1108_v10 }
 0x277   :  { %3525 = vmatpush3.msra.mxu1 %v1108_v10 }
 0x278   :  { %1248 = vmatmul.mubr.f32.gmra.mxu1 %v3062_v11  ;;  %3526 = vmatprep.subr.mxu1 %v1107_v13 }
 0x279   :  { %3085 = vmatprep.mubr.msk.f32.mxu1 %vm108_vm0, %v3065_v14  ;;  %3527 = vmatpush3.msra.mxu1 %v1107_v13 }
 0x27a   :  { %3528 = vmatprep.subr.mxu1 %v1106_v16 }
 0x27b   :  { %3529 = vmatpush3.msra.mxu1 %v1106_v16 }
 0x27c   :  { %1253 = vmatmul.mubr.f32.gmra.mxu1 %v3064_v17  ;;  %3530 = vmatprep.subr.mxu1 %v1105_v33 }
 0x27d   :  { %3086 = vmatprep.mubr.msk.f32.mxu1 %vm108_vm0, %v3067_v18  ;;  %3531 = vmatpush3.msra.mxu1 %v1105_v33 }
 0x27e   :  { %3532 = vmatprep.subr.mxu1 %v1104_v37 }
 0x27f   :  { %3533 = vmatpush3.msra.mxu1 %v1104_v37 }
 0x280   :  { %1258 = vmatmul.mubr.f32.gmra.mxu1 %v3066_v20 }
 0x281   :  { %3087 = vmatprep.mubr.msk.f32.mxu1 %vm108_vm0, %v3069_v30 }
 0x284   :  { %1263 = vmatmul.mubr.f32.gmra.mxu1 %v3068_v35 }
 0x285   :  { %3088 = vmatprep.mubr.msk.f32.mxu1 %vm108_vm0, %v3071_v36 }
 0x288   :  { %1268 = vmatmul.mubr.f32.gmra.mxu1 %v3070_v41 }
 0x289   :  { %3089 = vmatprep.mubr.msk.f32.mxu1 %vm108_vm0, %v3073_v42 }
 0x28c   :  { %1273 = vmatmul.mubr.f32.gmra.mxu1 %v3072_v43 }
 0x28d   :  { %3090 = vmatprep.mubr.msk.f32.mxu1 %vm108_vm0, %v3075_v44 }
 0x290   :  { %1278 = vmatmul.mubr.f32.gmra.mxu1 %v3074_v45 }
 0x291   :  { %3091 = vmatprep.mubr.msk.f32.mxu1 %vm108_vm0, %v3077_v34 }
 0x294   :  { %1283 = vmatmul.mubr.f32.gmra.mxu1 %v3076_v51  ;;  %v3134_v51 = vld [vmem:[%s5275_s4 + $0x1c0] sm:$0xff] }
 0x295   :  { %3092 = vmatprep.mubr.msk.f32.mxu1 %vm108_vm0, %v3079_v55  ;;  %v3137_v55 = vld [vmem:[%s5275_s4 + $0x1d8] sm:$0xff] }
 0x298   :  { %1288 = vmatmul.mubr.f32.gmra.mxu1 %v3078_v38  ;;  %v3136_v38 = vld [vmem:[%s5275_s4 + $0x1d0] sm:$0xff] }
 0x299   :  { %3093 = vmatprep.mubr.msk.f32.mxu1 %vm108_vm0, %v3081_v52  ;;  %v3139_v52 = vld [vmem:[%s5275_s4 + $0x1e8] sm:$0xff] }
 0x29c   :  { %1293 = vmatmul.mubr.f32.gmra.mxu1 %v3080_v58  ;;  %v3138_v58 = vld [vmem:[%s5275_s4 + $0x1e0] sm:$0xff] }
 0x300   :  { %v1045_v62 = vpop.f32.mrf.mxu1 }
 0x301   :  { %3534 = vmatprep.mubr.msk.f32.mxu1 %vm108_vm0, %v1045_v62  ;;  %v3143_v62 = vld [vmem:[%s5275_s4 + $0x208] sm:$0xff] }
 0x302   :  { %v1047_v50 = vpop.f32.mrf.mxu1 }
 0x303   :  { %v3142_v50 = vld [vmem:[%s5275_s4 + $0x200] sm:$0xff] }
 0x304   :  { %v1050_v0 = vpop.f32.mrf.mxu1 }
 0x305   :  { %3535 = vmatmul.mubr.msk.f32.vlgmr.msra.gmra.mxu1 %vm108_vm0, %v1050_v0  ;;  %v3145_v0 = vld [vmem:[%s5275_s4 + $0x218] sm:$0xff] }
 0x306   :  { %v1052_v2 = vpop.f32.mrf.mxu1 }
 0x307   :  { %v3144_v2 = vld [vmem:[%s5275_s4 + $0x210] sm:$0xff] }
 0x308   :  { %v1055_v3 = vpop.f32.mrf.mxu1 }
 0x309   :  { %3537 = vmatprep.mubr.msk.f32.mxu1 %vm108_vm0, %v1055_v3  ;;  %v3147_v3 = vld [vmem:[%s5275_s4 + $0x228] sm:$0xff] }
 0x30a   :  { %v1057_v47 = vpop.f32.mrf.mxu1 }
 0x30b   :  { %v3146_v47 = vld [vmem:[%s5275_s4 + $0x220] sm:$0xff] }
 0x30c   :  { %v1060_v4 = vpop.f32.mrf.mxu1 }
 0x30d   :  { %3538 = vmatmul.mubr.msk.f32.gmra.mxu1 %vm108_vm0, %v1060_v4  ;;  %v3149_v4 = vld [vmem:[%s5275_s4 + $0x238] sm:$0xff] }
 0x30e   :  { %v1062_v5 = vpop.f32.mrf.mxu1 }
 0x30f   :  { %v3148_v5 = vld [vmem:[%s5275_s4 + $0x230] sm:$0xff] }
 0x310   :  { %v1065_v7 = vpop.f32.mrf.mxu1 }
 0x311   :  { %3540 = vmatprep.mubr.msk.f32.mxu1 %vm108_vm0, %v1065_v7  ;;  %v3169_v7 = vld [vmem:[%s5276_s5 + $0xb8] sm:$0xff] }
 0x312   :  { %v1067_v8 = vpop.f32.mrf.mxu1  ;;  %3552 = vmatprep.subr.mxu1 %v3169_v7 }
 0x313   :  { %v3168_v8 = vld [vmem:[%s5276_s5 + $0xb0] sm:$0xff]  ;;  %3553 = vmatpush3.msra.mxu1 %v3169_v7 }
 0x314   :  { %v1070_v9 = vpop.f32.mrf.mxu1  ;;  %3554 = vmatprep.subr.mxu1 %v3168_v8 }
 0x315   :  { %3541 = vmatmul.mubr.msk.f32.gmra.mxu1 %vm108_vm0, %v1070_v9  ;;  %v3167_v9 = vld [vmem:[%s5276_s5 + $0xa8] sm:$0xff] }
 0x316   :  { %v1072_v10 = vpop.f32.mrf.mxu1  ;;  %3555 = vmatpush3.msra.mxu1 %v3168_v8 }
 0x317   :  { %3556 = vmatprep.subr.mxu1 %v3167_v9  ;;  %v3166_v10 = vld [vmem:[%s5276_s5 + $0xa0] sm:$0xff] }
 0x318   :  { %v1075_v11 = vpop.f32.mrf.mxu1  ;;  %3557 = vmatpush3.msra.mxu1 %v3167_v9  ;;  %v2067_v9 = vpop.permute.xlu0 %2066 }
 0x319   :  { %3543 = vmatprep.mubr.msk.f32.mxu1 %vm108_vm0, %v1075_v11  ;;  %3558 = vmatprep.subr.mxu1 %v3166_v10  ;;  %v3165_v11 = vld [vmem:[%s5276_s5 + $0x98] sm:$0xff] }
 0x31a   :  { %v1077_v13 = vpop.f32.mrf.mxu1  ;;  %3559 = vmatpush3.msra.mxu1 %v3166_v10 }
 0x31b   :  { %v3164_v13 = vld [vmem:[%s5276_s5 + $0x90] sm:$0xff]  ;;  %3560 = vmatprep.subr.mxu1 %v3165_v11 }
 0x31c   :  { %v1080_v14 = vpop.f32.mrf.mxu1  ;;  %3561 = vmatpush3.msra.mxu1 %v3165_v11  ;;  %v2062_v11 = vpop.permute.xlu1 %2061 }
 0x31d   :  { %3544 = vmatmul.mubr.msk.f32.gmra.mxu1 %vm108_vm0, %v1080_v14  ;;  %3562 = vmatprep.subr.mxu1 %v3164_v13  ;;  %v3163_v14 = vld [vmem:[%s5276_s5 + $0x88] sm:$0xff] }
 0x31e   :  { %v1082_v16 = vpop.f32.mrf.mxu1  ;;  %3563 = vmatpush3.msra.mxu1 %v3164_v13 }
 0x31f   :  { %3564 = vmatprep.subr.mxu1 %v3163_v14  ;;  %v3162_v16 = vld [vmem:[%s5276_s5 + $0x80] sm:$0xff] }
 0x320   :  { %v1085_v17 = vpop.f32.mrf.mxu1  ;;  %3565 = vmatpush3.msra.mxu1 %v3163_v14  ;;  %v2057_v14 = vpop.permute.xlu0 %2056 }
 0x321   :  { %3546 = vmatprep.mubr.msk.f32.mxu1 %vm108_vm0, %v1085_v17  ;;  %3566 = vmatprep.subr.mxu1 %v3162_v16 }
 0x322   :  { %v1087_v18 = vpop.f32.mrf.mxu1  ;;  %3567 = vmatpush3.msra.mxu1 %v3162_v16 }
 0x324   :  { %v1090_v20 = vpop.f32.mrf.mxu1 }
 0x325   :  { %3547 = vmatmul.mubr.msk.f32.gmra.mxu1 %vm108_vm0, %v1090_v20 }
 0x326   :  { %v1092_v30 = vpop.f32.mrf.mxu1 }
 0x328   :  { %v1095_v33 = vpop.f32.mrf.mxu1 }
 0x329   :  { %3549 = vmatprep.mubr.msk.f32.mxu1 %vm108_vm0, %v1095_v33 }
 0x32a   :  { %v1097_v35 = vpop.f32.mrf.mxu1 }
 0x32c   :  { %v1100_v36 = vpop.f32.mrf.mxu1 }
 0x32d   :  { %3550 = vmatmul.mubr.msk.f32.gmra.mxu1 %vm108_vm0, %v1100_v36 }
 0x32e   :  { %v1102_v37 = vpop.f32.mrf.mxu1 }
 0x330   :  { %v1239_v39 = vpop.f32.mrf.mxu1 }
 0x331   :  { %3500 = vmatprep.mubr.msk.f32.mxu0 %vm108_vm0, %v1239_v39 }
 0x332   :  { %v1241_v41 = vpop.f32.mrf.mxu1 }
 0x334   :  { %v1244_v42 = vpop.f32.mrf.mxu1 }
 0x335   :  { %3501 = vmatmul.mubr.msk.f32.vlgmr.msra.gmra.mxu0 %vm108_vm0, %v1244_v42 }
 0x336   :  { %1691 = vmatpush1.msra.mxu0 %v4452_v25  ;;  %v1246_v43 = vpop.f32.mrf.mxu1 }
 0x337   :  { %1692 = vmatprep.subr.mxu0 %v3933_v1 }
 0x338   :  { %1693 = vmatpush1.msra.mxu0 %v4455_v31  ;;  %v1249_v44 = vpop.f32.mrf.mxu1 }
 0x339   :  { %1694 = vmatprep.subr.mxu0 %v3933_v1  ;;  %3503 = vmatprep.mubr.msk.f32.mxu0 %vm108_vm0, %v1249_v44 }
 0x33a   :  { %1695 = vmatpush1.msra.mxu0 %v4460_v40  ;;  %v1251_v45 = vpop.f32.mrf.mxu1 }
 0x33b   :  { %1696 = vmatprep.subr.mxu0 %v3933_v1 }
 0x33c   :  { %1697 = vmatpush1.msra.mxu0 %v4465_v46  ;;  %v1254_v34 = vpop.f32.mrf.mxu1 }
 0x33d   :  { %1698 = vmatprep.subr.mxu0 %v3933_v1  ;;  %3504 = vmatmul.mubr.msk.f32.gmra.mxu0 %vm108_vm0, %v1254_v34 }
 0x33e   :  { %1699 = vmatpush1.msra.mxu0 %v4469_v54  ;;  %v1256_v25 = vpop.f32.mrf.mxu1 }
 0x33f   :  { %1700 = vmatprep.subr.mxu0 %v3933_v1 }
 0x340   :  { %1701 = vmatpush1.msra.mxu0 %v4473_v56  ;;  %v1259_v31 = vpop.f32.mrf.mxu1 }
 0x341   :  { %1702 = vmatprep.subr.mxu0 %v3933_v1  ;;  %3506 = vmatprep.mubr.msk.f32.mxu0 %vm108_vm0, %v1259_v31 }
 0x342   :  { %1703 = vmatpush1.msra.mxu0 %v4479_v59  ;;  %v1261_v40 = vpop.f32.mrf.mxu1 }
 0x343   :  { %1704 = vmatprep.subr.mxu0 %v3933_v1 }
 0x344   :  { %1705 = vmatpush1.msra.mxu0 %v4491_v63  ;;  %v1264_v46 = vpop.f32.mrf.mxu1 }
 0x345   :  { %1706 = vmatprep.subr.mxu0 %v3933_v1  ;;  %3507 = vmatmul.mubr.msk.f32.gmra.mxu0 %vm108_vm0, %v1264_v46 }
 0x346   :  { %1707 = vmatpush1.msra.mxu0 %v4476_v57  ;;  %v1266_v54 = vpop.f32.mrf.mxu1 }
 0x347   :  { %1708 = vmatprep.subr.mxu0 %v3933_v1 }
 0x348   :  { %1709 = vmatpush1.msra.mxu0 %v4488_v61  ;;  %v1269_v56 = vpop.f32.mrf.mxu1 }
 0x349   :  { %1710 = vmatprep.subr.mxu0 %v3933_v1  ;;  %3509 = vmatprep.mubr.msk.f32.mxu0 %vm108_vm0, %v1269_v56 }
 0x34a   :  { %1711 = vmatpush1.msra.mxu0 %v4504_v6  ;;  %v1271_v59 = vpop.f32.mrf.mxu1 }
 0x34b   :  { %1712 = vmatprep.subr.mxu0 %v3933_v1 }
 0x34c   :  { %1713 = vmatpush1.msra.mxu0 %v4508_v48  ;;  %v1274_v63 = vpop.f32.mrf.mxu1 }
 0x34d   :  { %1714 = vmatprep.subr.mxu0 %v3933_v1  ;;  %3510 = vmatmul.mubr.msk.f32.gmra.mxu0 %vm108_vm0, %v1274_v63 }
 0x34e   :  { %1715 = vmatpush1.msra.mxu0 %v4512_v12  ;;  %v1276_v57 = vpop.f32.mrf.mxu1 }
 0x34f   :  { %1716 = vmatprep.subr.mxu0 %v3933_v1 }
 0x350   :  { %1717 = vmatpush1.msra.mxu0 %v4516_v15  ;;  %v1279_v61 = vpop.f32.mrf.mxu1 }
 0x351   :  { %1718 = vmatprep.subr.mxu0 %v3933_v1  ;;  %3512 = vmatprep.mubr.msk.f32.mxu0 %vm108_vm0, %v1279_v61 }
 0x352   :  { %1719 = vmatpush1.msra.mxu0 %v4521_v19  ;;  %v1281_v6 = vpop.f32.mrf.mxu1 }
 0x353   :  { %1720 = vmatprep.subr.mxu0 %v3933_v1 }
 0x354   :  { %1721 = vmatpush1.msra.mxu0 %v4525_v21  ;;  %v1284_v48 = vpop.f32.mrf.mxu1  ;;  %v3127_v21 = vld [vmem:[%s5275_s4 + $0x188] sm:$0xff] }
 0x355   :  { %1738 = vmatprep.subr.mxu0 %v3933_v1  ;;  %3513 = vmatmul.mubr.msk.f32.gmra.mxu0 %vm108_vm0, %v1284_v48 }
 0x356   :  { %1739 = vmatpush2.msra.mxu0 %v4529_v22  ;;  %v1286_v12 = vpop.f32.mrf.mxu1 }
 0x357   :  { %1740 = vmatprep.subr.mxu0 %v3933_v1 }
 0x358   :  { %1741 = vmatpush2.msra.mxu0 %v4533_v23  ;;  %v1289_v15 = vpop.f32.mrf.mxu1 }
 0x359   :  { %1742 = vmatprep.subr.mxu0 %v3933_v1  ;;  %3515 = vmatprep.mubr.msk.f32.mxu0 %vm108_vm0, %v1289_v15 }
 0x35a   :  { %1743 = vmatpush2.msra.mxu0 %v4537_v24  ;;  %v1291_v19 = vpop.f32.mrf.mxu1  ;;  %v3126_v24 = vld [vmem:[%s5275_s4 + $0x180] sm:$0xff] }
 0x35b   :  { %1744 = vmatprep.subr.mxu0 %v3933_v1 }
 0x35c   :  { %1745 = vmatpush2.msra.mxu0 %v4541_v26  ;;  %v1294_v22 = vpop.f32.mrf.mxu1  ;;  %v3129_v26 = vld [vmem:[%s5275_s4 + $0x198] sm:$0xff] }
 0x35d   :  { %1746 = vmatprep.subr.mxu0 %v3933_v1  ;;  %3516 = vmatmul.mubr.msk.f32.gmra.mxu0 %vm108_vm0, %v1294_v22 }
 0x35e   :  { %1747 = vmatpush2.msra.mxu0 %v4545_v27  ;;  %v1296_v23 = vpop.f32.mrf.mxu1  ;;  %3150 = vmatprep.mubr.msk.f32.mxu0 %vm108_vm0, %v3127_v21  ;;  %v3128_v27 = vld [vmem:[%s5275_s4 + $0x190] sm:$0xff] }
 0x35f   :  { %1748 = vmatprep.subr.mxu0 %v3933_v1 }
 0x360   :  { %1749 = vmatpush2.msra.mxu0 %v4549_v28  ;;  %v3131_v28 = vld [vmem:[%s5275_s4 + $0x1a8] sm:$0xff] }
 0x361   :  { %1750 = vmatprep.subr.mxu0 %v3933_v1 }
 0x362   :  { %1751 = vmatpush2.msra.mxu0 %v4553_v29  ;;  %v3133_v29 = vld [vmem:[%s5275_s4 + $0x1b8] sm:$0xff] }
 0x363   :  { %1752 = vmatprep.subr.mxu0 %v3933_v1  ;;  %v3130_v1 = vld [vmem:[%s5275_s4 + $0x1a0] sm:$0xff] }
 0x364   :  { %1753 = vmatpush2.msra.mxu0 %v4560_v32  ;;  %v3132_v32 = vld [vmem:[%s5275_s4 + $0x1b0] sm:$0xff] }
 0x365   :  { %1755 = vmatmul.mubr.f32.vlgmr.msra.gmra.mxu0 %v3126_v24 }
 0x366   :  { %3151 = vmatprep.mubr.msk.f32.mxu0 %vm108_vm0, %v3129_v26 }
 0x369   :  { %1760 = vmatmul.mubr.f32.gmra.mxu0 %v3128_v27 }
 0x36a   :  { %3152 = vmatprep.mubr.msk.f32.mxu0 %vm108_vm0, %v3131_v28  ;;  %v3215_v28 = vld [vmem:[%s5279_s8 + $0x38] sm:$0xff] }
 0x36b   :  { %3652 = vmatprep.subr.mxu0 %v3215_v28 }
 0x36c   :  { %3653 = vmatpush3.msra.mxu0 %v3215_v28 }
 0x36d   :  { %1765 = vmatmul.mubr.f32.gmra.mxu0 %v3130_v1  ;;  %v3214_v1 = vld [vmem:[%s5279_s8 + $0x30] sm:$0xff] }
 0x36e   :  { %3153 = vmatprep.mubr.msk.f32.mxu0 %vm108_vm0, %v3133_v29  ;;  %v3213_v29 = vld [vmem:[%s5279_s8 + $0x28] sm:$0xff]  ;;  %3654 = vmatprep.subr.mxu0 %v3214_v1 }
 0x36f   :  { %3655 = vmatpush3.msra.mxu0 %v3214_v1 }
 0x370   :  { %3656 = vmatprep.subr.mxu0 %v3213_v29 }
 0x371   :  { %1770 = vmatmul.mubr.f32.gmra.mxu0 %v3132_v32  ;;  %v3212_v32 = vld [vmem:[%s5279_s8 + $0x20] sm:$0xff] }
 0x372   :  { %3154 = vmatprep.mubr.msk.f32.mxu0 %vm108_vm0, %v3135_v53  ;;  %3657 = vmatpush3.msra.mxu0 %v3213_v29 }
 0x373   :  { %3658 = vmatprep.subr.mxu0 %v3212_v32 }
 0x374   :  { %3659 = vmatpush3.msra.mxu0 %v3212_v32 }
 0x375   :  { %1775 = vmatmul.mubr.f32.gmra.mxu0 %v3134_v51  ;;  %v2153_v51 = vld [vmem:[%s5278_s7] sm:$0xff] }
 0x376   :  { %3155 = vmatprep.mubr.msk.f32.mxu0 %vm108_vm0, %v3137_v55 }
 0x379   :  { %1780 = vmatmul.mubr.f32.gmra.mxu0 %v3136_v38 }
 0x37a   :  { %3156 = vmatprep.mubr.msk.f32.mxu0 %vm108_vm0, %v3139_v52 }
 0x37d   :  { %1785 = vmatmul.mubr.f32.gmra.mxu0 %v3138_v58 }
 0x37e   :  { %3157 = vmatprep.mubr.msk.f32.mxu0 %vm108_vm0, %v3141_v49 }
 0x381   :  { %1790 = vmatmul.mubr.f32.gmra.mxu0 %v3140_v60 }
 0x382   :  { %3158 = vmatprep.mubr.msk.f32.mxu0 %vm108_vm0, %v3143_v62 }
 0x385   :  { %1795 = vmatmul.mubr.f32.gmra.mxu0 %v3142_v50 }
 0x386   :  { %3159 = vmatprep.mubr.msk.f32.mxu0 %vm108_vm0, %v3145_v0 }
 0x389   :  { %1800 = vmatmul.mubr.f32.gmra.mxu0 %v3144_v2 }
 0x38a   :  { %3160 = vmatprep.mubr.msk.f32.mxu0 %vm108_vm0, %v3147_v3 }
 0x38d   :  { %1805 = vmatmul.mubr.f32.gmra.mxu0 %v3146_v47 }
 0x38e   :  { %3161 = vmatprep.mubr.msk.f32.mxu0 %vm108_vm0, %v3149_v4 }
 0x391   :  { %1810 = vmatmul.mubr.f32.gmra.mxu0 %v3148_v5 }
 0x3c5   :  { %v5037_v53 = vpop.f32.mrf.mxu1 }
 0x3c7   :  { %v5043_v55 = vpop.f32.mrf.mxu1 }
 0x3cd   :  { %v3539_v38 = vpop.f32.mrf.mxu1 }
 0x3cf   :  { %v1580_v52 = vpop.f32.mrf.mxu1 }
 0x3d5   :  { %v3542_v58 = vpop.f32.mrf.mxu1 }
 0x3d7   :  { %v1590_v49 = vpop.f32.mrf.mxu1 }
 0x3dd   :  { %v3545_v60 = vpop.f32.mrf.mxu1 }
 0x3df   :  { %v1600_v62 = vpop.f32.mrf.mxu1 }
 0x3e5   :  { %v3548_v50 = vpop.f32.mrf.mxu1 }
 0x3e7   :  { %v1610_v0 = vpop.f32.mrf.mxu1 }
 0x3ed   :  { %v3551_v2 = vpop.f32.mrf.mxu1 }
 0x3ef   :  { %v1620_v3 = vpop.f32.mrf.mxu1 }
 0x3f5   :  { %v4989_v17 = vpop.f32.mrf.mxu0 }
 0x3f7   :  { %v4991_v18 = vpop.f32.mrf.mxu0 }
 0x3fd   :  { %v4993_v20 = vpop.f32.mrf.mxu0 }
 0x3ff   :  { %v4995_v30 = vpop.f32.mrf.mxu0 }
 0x405   :  { %v4997_v33 = vpop.f32.mrf.mxu0 }
 0x407   :  { %v4999_v35 = vpop.f32.mrf.mxu0 }
 0x40d   :  { %v5001_v36 = vpop.f32.mrf.mxu0 }
 0x40f   :  { %v5003_v37 = vpop.f32.mrf.mxu0 }
 0x415   :  { %v5005_v39 = vpop.f32.mrf.mxu0 }
 0x417   :  { %v5007_v41 = vpop.f32.mrf.mxu0 }
 0x41d   :  { %v5009_v42 = vpop.f32.mrf.mxu0 }
 0x41f   :  { %v5011_v43 = vpop.f32.mrf.mxu0 }
 0x425   :  { %v1756_v44 = vpop.f32.mrf.mxu0 }
 0x426   :  { %3568 = vmatprep.mubr.msk.f32.mxu1 %vm108_vm0, %v1756_v44  ;;  %v2052_v44 = vpop.permute.xlu1 %2051 }
 0x427   :  { %v1758_v45 = vpop.f32.mrf.mxu0 }
 0x428   :  { %v1616_v45 = vadd.f32 %v3548_v50, %v5005_v39  ;;  %v1596_v39 = vadd.f32 %v3542_v58, %v4997_v33  ;;  %v1576_v50 = vadd.f32 %v5037_v53, %v4989_v17 }
 0x429   :  { %v1761_v34 = vpop.f32.mrf.mxu0 }
 0x42a   :  { %3569 = vmatmul.mubr.msk.f32.vlgmr.msra.gmra.mxu1 %vm108_vm0, %v1761_v34 }
 0x42b   :  { %v1763_v25 = vpop.f32.mrf.mxu0 }
 0x42c   :  { %v1611_v25 = vadd.f32 %v1610_v0, %v5007_v41  ;;  %v1621_v41 = vadd.f32 %v1620_v3, %v5011_v43  ;;  %v1581_v43 = vadd.f32 %v1580_v52, %v4995_v30  ;;  %v1571_v3 = vadd.f32 %v5043_v55, %v4991_v18 }
 0x42d   :  { %v1766_v31 = vpop.f32.mrf.mxu0 }
 0x42e   :  { %3571 = vmatprep.mubr.msk.f32.mxu1 %vm108_vm0, %v1766_v31 }
 0x42f   :  { %v1768_v40 = vpop.f32.mrf.mxu0 }
 0x431   :  { %v1771_v46 = vpop.f32.mrf.mxu0 }
 0x432   :  { %3572 = vmatmul.mubr.msk.f32.gmra.mxu1 %vm108_vm0, %v1771_v46  ;;  %v2047_v46 = vpop.permute.xlu0 %2046 }
 0x433   :  { %v1773_v54 = vpop.f32.mrf.mxu0 }
 0x435   :  { %v1776_v56 = vpop.f32.mrf.mxu0 }
 0x436   :  { %3574 = vmatprep.mubr.msk.f32.mxu1 %vm108_vm0, %v1776_v56  ;;  %v2042_v56 = vpop.permute.xlu1 %2041 }
 0x437   :  { %v1778_v59 = vpop.f32.mrf.mxu0 }
 0x438   :  { %v1606_v59 = vadd.f32 %v3545_v60, %v5001_v36 }
 0x439   :  { %v1781_v63 = vpop.f32.mrf.mxu0 }
 0x43a   :  { %3575 = vmatmul.mubr.msk.f32.gmra.mxu1 %vm108_vm0, %v1781_v63  ;;  %v2032_v36 = vpop.permute.xlu1 %2031 }
 0x43b   :  { %v1783_v57 = vpop.f32.mrf.mxu0 }
 0x43c   :  { %v1601_v57 = vadd.f32 %v1600_v62, %v5003_v37 }
 0x43d   :  { %v1786_v61 = vpop.f32.mrf.mxu0 }
 0x43e   :  { %3577 = vmatprep.mubr.msk.f32.mxu1 %vm108_vm0, %v1786_v61  ;;  %v1626_v61 = vadd.f32 %v3551_v2, %v5009_v42  ;;  %v1586_v42 = vadd.f32 %v3539_v38, %v4993_v20  ;;  %v2022_v0 = vpop.permute.xlu1 %2021 }
 0x43f   :  { %v1788_v6 = vpop.f32.mrf.mxu0 }
 0x441   :  { %v1791_v48 = vpop.f32.mrf.mxu0 }
 0x442   :  { %3578 = vmatmul.mubr.msk.f32.gmra.mxu1 %vm108_vm0, %v1791_v48  ;;  %v2012_v53 = vpop.permute.xlu1 %2011 }
 0x443   :  { %v1793_v12 = vpop.f32.mrf.mxu0 }
 0x445   :  { %v1796_v15 = vpop.f32.mrf.mxu0 }
 0x446   :  { %3580 = vmatprep.mubr.msk.f32.mxu1 %vm108_vm0, %v1796_v15  ;;  %v2037_v15 = vpop.permute.xlu0 %2036 }
 0x447   :  { %v1798_v19 = vpop.f32.mrf.mxu0 }
 0x449   :  { %v1801_v21 = vpop.f32.mrf.mxu0 }
 0x44a   :  { %3581 = vmatmul.mubr.msk.f32.gmra.mxu1 %vm108_vm0, %v1801_v21  ;;  %v2027_v60 = vpop.permute.xlu0 %2026 }
 0x44b   :  { %v1803_v22 = vpop.f32.mrf.mxu0 }
 0x44c   :  { %v1591_v22 = vadd.f32 %v1590_v49, %v4999_v35 }
 0x44d   :  { %v1806_v23 = vpop.f32.mrf.mxu0 }
 0x44e   :  { %3583 = vmatprep.mubr.msk.f32.mxu1 %vm108_vm0, %v1806_v23 }
 0x44f   :  { %v1808_v24 = vpop.f32.mrf.mxu0 }
 0x451   :  { %v1811_v26 = vpop.f32.mrf.mxu0 }
 0x452   :  { %3584 = vmatmul.mubr.msk.f32.gmra.mxu1 %vm108_vm0, %v1811_v26 }
 0x453   :  { %v1813_v27 = vpop.f32.mrf.mxu0  ;;  %3610 = vmatprep.mubr.msk.f32.mxu1 %vm2159_vm1, %v2153_v51 }
 0x4ea   :  { %v3570_v47 = vpop.f32.mrf.mxu1 }
 0x4eb   :  { %v1986_v30 = vadd.f32 %v3570_v47, %v1576_v50  ;;  %v3202_v50 = vld [vmem:[%s5278_s7 + $0x40] sm:$0xff] }
 0x4ec   :  { %v5045_v4 = vpop.f32.mrf.mxu1 }
 0x4f2   :  { %v3573_v5 = vpop.f32.mrf.mxu1 }
 0x4f3   :  { %v1988_v58 = vadd.f32 %v3573_v5, %v1586_v42 }
 0x4f4   :  { %v1936_v7 = vpop.f32.mrf.mxu1 }
 0x4f5   :  { %v1987_v20 = vadd.f32 %v1936_v7, %v1581_v43  ;;  %v2072_v52 = vadd.f32 %v2027_v60, %v1988_v58  ;;  %v2156_v43 = vld [vmem:[%s5278_s7 + $0x18] sm:$0xff]  ;;  %v2157_v58 = vld [vmem:[%s5278_s7 + $0x20] sm:$0xff]  ;;  %v2158_v60 = vld [vmem:[%s5278_s7 + $0x28] sm:$0xff] }
 0x4fa   :  { %v3576_v8 = vpop.f32.mrf.mxu1 }
 0x4fb   :  { %v1990_v26 = vadd.f32 %v3576_v8, %v1596_v39  ;;  %v1985_v8 = vadd.f32 %v5045_v4, %v1571_v3  ;;  %v2274_v3 = vld [vmem:[%s5279_s8 + $0x8] sm:$0xff] }
 0x4fc   :  { %v1946_v10 = vpop.f32.mrf.mxu1 }
 0x4fd   :  { %v1989_v29 = vadd.f32 %v1946_v10, %v1591_v22  ;;  %v2074_v35 = vadd.f32 %v2037_v15, %v1990_v26  ;;  %v2071_v10 = vadd.f32 %v2022_v0, %v1987_v20  ;;  %v2069_v7 = vadd.f32 %v2012_v53, %v1985_v8  ;;  %v2275_v0 = vld [vmem:[%s5279_s8 + $0x10] sm:$0xff]  ;;  %v3203_v20 = vld [vmem:[%s5278_s7 + $0x48] sm:$0xff] }
 0x4ff   :  { %v2073_v38 = vadd.f32 %v2032_v36, %v1989_v29  ;;  %v3187_v5 = vmul.f32 -1.442695, %v2074_v35  ;;  %v3182_v55 = vmul.f32 -1.442695, %v2069_v7  ;;  %v3200_v35 = vld [vmem:[%s5278_s7 + $0x30] sm:$0xff] }
 0x502   :  { %v3579_v13 = vpop.f32.mrf.mxu1 }
 0x503   :  { %v1992_v6 = vadd.f32 %v3579_v13, %v1606_v59  ;;  %v3185_v13 = vmul.f32 -1.442695, %v2072_v52 }
 0x504   :  { %v1956_v16 = vpop.f32.mrf.mxu1 }
 0x505   :  { %v1991_v19 = vadd.f32 %v1956_v16, %v1601_v57  ;;  %v2076_v27 = vadd.f32 %v2047_v46, %v1992_v6 }
 0x507   :  { %v2075_v32 = vadd.f32 %v2042_v56, %v1991_v19  ;;  %v3189_v49 = vmul.f32 -1.442695, %v2076_v27 }
 0x509   :  { %v3188_v2 = vmul.f32 -1.442695, %v2075_v32 }
 0x50a   :  { %v3582_v34 = vpop.f32.mrf.mxu1 }
 0x50b   :  { %v1994_v31 = vadd.f32 %v3582_v34, %v1616_v45 }
 0x50c   :  { %v1966_v40 = vpop.f32.mrf.mxu1 }
 0x50d   :  { %v1993_v54 = vadd.f32 %v1966_v40, %v1611_v25  ;;  %v2078_v63 = vadd.f32 %v2057_v14, %v1994_v31  ;;  %v3184_v14 = vmul.f32 -1.442695, %v2071_v10 }
 0x50f   :  { %v2077_v48 = vadd.f32 %v2052_v44, %v1993_v54  ;;  %v3191_v23 = vmul.f32 -1.442695, %v2078_v63 }
 0x511   :  { %v3190_v1 = vmul.f32 -1.442695, %v2077_v48  ;;  %3839 = vpow2.f32 %v3191_v23 }
 0x512   :  { %v3585_v12 = vpop.f32.mrf.mxu1 }
 0x513   :  { %v1996_v21 = vadd.f32 %v3585_v12, %v1626_v61 }
 0x514   :  { %v1976_v24 = vpop.f32.mrf.mxu1 }
 0x515   :  { %v2080_v37 = vadd.f32 %v2067_v9, %v1996_v21  ;;  %v1995_v28 = vadd.f32 %v1976_v24, %v1621_v41  ;;  %v2017_v9 = vpop.permute.xlu0 %2016 }
 0x516   :  { %v2070_v17 = vadd.f32 %v2017_v9, %v1986_v30  ;;  %v2273_v30 = vld [vmem:[%s5279_s8] sm:$0xff] }
 0x517   :  { %v3193_v51 = vmul.f32 -1.442695, %v2080_v37  ;;  %v2079_v33 = vadd.f32 %v2062_v11, %v1995_v28  ;;  %v3186_v11 = vmul.f32 -1.442695, %v2073_v38  ;;  %v3204_v38 = vld [vmem:[%s5278_s7 + $0x50] sm:$0xff] }
 0x518   :  { %v3183_v16 = vmul.f32 -1.442695, %v2070_v17 }
 0x519   :  { %3841 = vpow2.f32 %v3193_v51  ;;  %v3192_v62 = vmul.f32 -1.442695, %v2079_v33  ;;  %v2154_v51 = vld [vmem:[%s5278_s7 + $0x8] sm:$0xff]  ;;  %v2155_v33 = vld [vmem:[%s5278_s7 + $0x10] sm:$0xff] }
 0x51a   :  { %3843 = vpow2.f32 %v3190_v1 }
 0x51b   :  { %3845 = vpow2.f32 %v3192_v62  ;;  %v2276_v62 = vld [vmem:[%s5279_s8 + $0x18] sm:$0xff] }
 0x51c   :  { %3847 = vpow2.f32 %v3189_v49  ;;  %v3201_v49 = vld [vmem:[%s5278_s7 + $0x38] sm:$0xff] }
 0x51d   :  { %3849 = vpow2.f32 %v3188_v2  ;;  %v3205_v2 = vld [vmem:[%s5278_s7 + $0x58] sm:$0xff] }
 0x51e   :  { %3851 = vpow2.f32 %v3187_v5  ;;  %v3840_v44 = vpop.eup %3839 }
 0x51f   :  { %3853 = vpow2.f32 %v3186_v11  ;;  %v2126_v34 = vadd.f32 1.0, %v3840_v44  ;;  %v3228_v44 = vld [vmem:[%s5278_s7 + $0x60] sm:$0xff] }
 0x520   :  { %3855 = vpow2.f32 %v3185_v13 }
 0x521   :  { %3857 = vpow2.f32 %v3184_v14 }
 0x522   :  { %3859 = vpow2.f32 %v3183_v16 }
 0x526   :  { %v3842_v18 = vpop.eup %3841 }
 0x527   :  { %v3844_v47 = vpop.eup %3843  ;;  %v2128_v45 = vadd.f32 1.0, %v3842_v18  ;;  %v3229_v18 = vld [vmem:[%s5278_s7 + $0x68] sm:$0xff] }
 0x528   :  { %v3846_v4 = vpop.eup %3845  ;;  %v2125_v40 = vadd.f32 1.0, %v3844_v47  ;;  %v3231_v47 = vld [vmem:[%s5278_s7 + $0x78] sm:$0xff] }
 0x529   :  { %3861 = vrcp.f32 %v2128_v45  ;;  %v2127_v25 = vadd.f32 1.0, %v3846_v4  ;;  %v3848_v31 = vpop.eup %3847  ;;  %v3232_v45 = vld [vmem:[%s5278_s7 + $0x80] sm:$0xff]  ;;  %v3233_v4 = vld [vmem:[%s5278_s7 + $0x88] sm:$0xff] }
 0x52a   :  { %3863 = vpow2.f32 %v3182_v55  ;;  %v3850_v46 = vpop.eup %3849  ;;  %v2124_v54 = vadd.f32 1.0, %v3848_v31  ;;  %v3230_v55 = vld [vmem:[%s5278_s7 + $0x70] sm:$0xff]  ;;  %v3241_v31 = vld [vmem:[%s5279_s8 + $0x48] sm:$0xff] }
 0x52b   :  { %3865 = vrcp.f32 %v2127_v25  ;;  %v3852_v56 = vpop.eup %3851  ;;  %v2123_v59 = vadd.f32 1.0, %v3850_v46  ;;  %v3242_v25 = vld [vmem:[%s5279_s8 + $0x50] sm:$0xff] }
 0x52c   :  { %3867 = vrcp.f32 %v2126_v34  ;;  %v3854_v63 = vpop.eup %3853  ;;  %v2122_v57 = vadd.f32 1.0, %v3852_v56  ;;  %v3243_v34 = vld [vmem:[%s5279_s8 + $0x58] sm:$0xff] }
 0x52d   :  { %3869 = vrcp.f32 %v2125_v40  ;;  %v3856_v61 = vpop.eup %3855  ;;  %v2121_v6 = vadd.f32 1.0, %v3854_v63  ;;  %v3240_v40 = vld [vmem:[%s5279_s8 + $0x40] sm:$0xff]  ;;  %s3935_s8 = smov [#allocation2]  }
 0x52e   :  { %3871 = vrcp.f32 %v2124_v54  ;;  %v3858_v48 = vpop.eup %3857  ;;  %v2120_v15 = vadd.f32 1.0, %v3856_v61  ;;  %s2963_s26 = sshll.u32 %s3935_s8, 4  ;;  %s2964_s26 = int_to_ptr.vmem [resolvable:$true] %s2963_s26 }
 0x52f   :  { %3873 = vrcp.f32 %v2123_v59  ;;  %v3860_v12 = vpop.eup %3859  ;;  %v2119_v19 = vadd.f32 1.0, %v3858_v48  ;;  %s3911_s27 = scalar_lea.vmem %s2964_s26, 768  ;;  %p3916_p1 = scmp.lt.s32.totalorder %s2964_s26, %s2964_s26 }
 0x530   :  { %3875 = vrcp.f32 %v2122_v57  ;;  %v2118_v22 = vadd.f32 1.0, %v3860_v12  ;;  %p3912_p0 = scmp.ne.s32.totalorder %s2964_s26, %s3911_s27  ;;  %p3917_p2 = scmp.lt.s32.totalorder %s3911_s27, %s3911_s27 }
 0x531   :  { %3877 = vrcp.f32 %v2121_v6 }
 0x532   :  { %3879 = vrcp.f32 %v2120_v15  ;;  %p3918_p3 = por %p3917_p2, %p3916_p1 }
 0x533   :  { %3881 = vrcp.f32 %v2119_v19 }
 0x534   :  { %3883 = vrcp.f32 %v2118_v22  ;;  %p3919_p4 = pnand %p3918_p3, %p3912_p0 }
 0x536   :  { %v5062_v39 = vpop.eup %3861 }
 0x537   :  { %v3864_v41 = vpop.eup %3863  ;;  %3586 = vmatprep.subr.mxu1 %v5062_v39  ;;  %3686 = vmatprep.subr.mxu0 %v5062_v39 }
 0x538   :  { %v5066_v21 = vpop.eup %3865  ;;  %3587 = vmatpush3.msra.mxu1 %v5062_v39  ;;  %v2117_v24 = vadd.f32 1.0, %v3864_v41 }
 0x539   :  { %3588 = vmatprep.subr.mxu1 %v5066_v21  ;;  %v5070_v23 = vpop.eup %3867 }
 0x53a   :  { %3589 = vmatpush3.msra.mxu1 %v5066_v21  ;;  %v5074_v36 = vpop.eup %3869  ;;  %3885 = vrcp.f32 %v2117_v24  ;;  %v2887_v24 = vpop.permute.xlu1 %2886 }
 0x53b   :  { %3590 = vmatprep.subr.mxu1 %v5070_v23  ;;  %v5078_v26 = vpop.eup %3871 }
 0x53c   :  { %3591 = vmatpush3.msra.mxu1 %v5070_v23  ;;  %v5082_v27 = vpop.eup %3873 }
 0x53d   :  { %3592 = vmatprep.subr.mxu1 %v5074_v36  ;;  %v5086_v37 = vpop.eup %3875 }
 0x53e   :  { %3593 = vmatpush3.msra.mxu1 %v5074_v36  ;;  %v5090_v28 = vpop.eup %3877 }
 0x53f   :  { %3594 = vmatprep.subr.mxu1 %v5078_v26  ;;  %v5094_v42 = vpop.eup %3879 }
 0x540   :  { %3595 = vmatpush3.msra.mxu1 %v5078_v26  ;;  %v5098_v1 = vpop.eup %3881 }
 0x541   :  { %3596 = vmatprep.subr.mxu1 %v5082_v27  ;;  %v5102_v29 = vpop.eup %3883 }
 0x542   :  { %3597 = vmatpush3.msra.mxu1 %v5082_v27 }
 0x543   :  { %3598 = vmatprep.subr.mxu1 %v5086_v37 }
 0x544   :  { %3599 = vmatpush3.msra.mxu1 %v5086_v37 }
 0x545   :  { %3600 = vmatprep.subr.mxu1 %v5090_v28 }
 0x546   :  { %3601 = vmatpush3.msra.mxu1 %v5090_v28 }
 0x547   :  { %3602 = vmatprep.subr.mxu1 %v5094_v42  ;;  %v5106_v32 = vpop.eup %3885 }
 0x548   :  { %3603 = vmatpush3.msra.mxu1 %v5094_v42 }
 0x549   :  { %3604 = vmatprep.subr.mxu1 %v5098_v1 }
 0x54a   :  { %3605 = vmatpush3.msra.mxu1 %v5098_v1 }
 0x54b   :  { %3606 = vmatprep.subr.mxu1 %v5102_v29 }
 0x54c   :  { %3607 = vmatpush3.msra.mxu1 %v5102_v29 }
 0x54d   :  { %3608 = vmatprep.subr.mxu1 %v5106_v32 }
 0x54e   :  { %3609 = vmatpush3.msra.mxu1 %v5106_v32 }
 0x54f   :  { %3611 = vmatmul.mubr.msk.f32.vlgmr.msra.gmra.mxu1 %vm2159_vm1, %v2154_v51  ;;  %3619 = vmatprep.subr.mxu1 %v5062_v39 }
 0x550   :  { %3620 = vmatpush3.msra.mxu1 %v5062_v39  ;;  %3613 = vmatprep.mubr.msk.f32.mxu1 %vm2159_vm1, %v2155_v33  ;;  %v2897_v33 = vpop.permute.xlu1 %2896 }
 0x551   :  { %3621 = vmatprep.subr.mxu1 %v5066_v21 }
 0x552   :  { %3622 = vmatpush3.msra.mxu1 %v5066_v21 }
 0x553   :  { %3623 = vmatprep.subr.mxu1 %v5070_v23  ;;  %3614 = vmatmul.mubr.msk.f32.gmra.mxu1 %vm2159_vm1, %v2156_v43 }
 0x554   :  { %3624 = vmatpush3.msra.mxu1 %v5070_v23  ;;  %3616 = vmatprep.mubr.msk.f32.mxu1 %vm2159_vm1, %v2157_v58 }
 0x555   :  { %3625 = vmatprep.subr.mxu1 %v5074_v36 }
 0x556   :  { %3626 = vmatpush3.msra.mxu1 %v5074_v36 }
 0x557   :  { %3627 = vmatprep.subr.mxu1 %v5078_v26  ;;  %3617 = vmatmul.mubr.msk.f32.gmra.mxu1 %vm2159_vm1, %v2158_v60 }
 0x558   :  { %3628 = vmatpush3.msra.mxu1 %v5078_v26  ;;  %3643 = vmatprep.mubr.msk.f32.mxu1 %vm2159_vm1, %v3200_v35 }
 0x559   :  { %3629 = vmatprep.subr.mxu1 %v5082_v27 }
 0x55a   :  { %3630 = vmatpush3.msra.mxu1 %v5082_v27 }
 0x55b   :  { %3631 = vmatprep.subr.mxu1 %v5086_v37 }
 0x55c   :  { %3632 = vmatpush3.msra.mxu1 %v5086_v37 }
 0x55d   :  { %3633 = vmatprep.subr.mxu1 %v5090_v28 }
 0x55e   :  { %3634 = vmatpush3.msra.mxu1 %v5090_v28 }
 0x55f   :  { %3635 = vmatprep.subr.mxu1 %v5094_v42 }
 0x560   :  { %3636 = vmatpush3.msra.mxu1 %v5094_v42 }
 0x561   :  { %3637 = vmatprep.subr.mxu1 %v5098_v1 }
 0x562   :  { %3638 = vmatpush3.msra.mxu1 %v5098_v1 }
 0x563   :  { %3639 = vmatprep.subr.mxu1 %v5102_v29 }
 0x564   :  { %3640 = vmatpush3.msra.mxu1 %v5102_v29 }
 0x565   :  { %3641 = vmatprep.subr.mxu1 %v5106_v32 }
 0x566   :  { %3642 = vmatpush3.msra.mxu1 %v5106_v32 }
 0x567   :  { %3644 = vmatmul.mubr.msk.f32.vlgmr.msra.gmra.mxu1 %vm2159_vm1, %v3201_v49  ;;  %3669 = vmatprep.subr.mxu1 %v2276_v62 }
 0x568   :  { %3646 = vmatprep.mubr.msk.f32.mxu1 %vm2159_vm1, %v3202_v50  ;;  %3670 = vmatpush3.msra.mxu1 %v2276_v62 }
 0x569   :  { %3671 = vmatprep.subr.mxu1 %v2275_v0 }
 0x56a   :  { %3672 = vmatpush3.msra.mxu1 %v2275_v0 }
 0x56b   :  { %3647 = vmatmul.mubr.msk.f32.gmra.mxu1 %vm2159_vm1, %v3203_v20  ;;  %3673 = vmatprep.subr.mxu1 %v2274_v3 }
 0x56c   :  { %3649 = vmatprep.mubr.msk.f32.mxu1 %vm2159_vm1, %v3204_v38  ;;  %3674 = vmatpush3.msra.mxu1 %v2274_v3 }
 0x56d   :  { %3675 = vmatprep.subr.mxu1 %v2273_v30 }
 0x56e   :  { %3676 = vmatpush3.msra.mxu1 %v2273_v30 }
 0x56f   :  { %3650 = vmatmul.mubr.msk.f32.gmra.mxu1 %vm2159_vm1, %v3205_v2  ;;  %3719 = vmatprep.subr.mxu1 %v3243_v34 }
 0x60f   :  { %v3612_v52 = vpop.f32.mrf.mxu1 }
 0x611   :  { %v2244_v5 = vpop.f32.mrf.mxu1 }
 0x612   :  { %3677 = vmatprep.mubr.msk.f32.mxu1 %vm2402_vm2, %v2244_v5 }
 0x613   :  { %3678 = vmatmul.mubr.msk.f32.vlgmr.msra.gmra.mxu1 %vm2402_vm2, %v3612_v52  ;;  %v3615_v8 = vpop.f32.mrf.mxu1 }
 0x614   :  { %3720 = vmatpush3.msra.mxu1 %v3243_v34 }
 0x615   :  { %v2254_v9 = vpop.f32.mrf.mxu1  ;;  %3721 = vmatprep.subr.mxu1 %v3242_v25 }
 0x616   :  { %3680 = vmatprep.mubr.msk.f32.mxu1 %vm2402_vm2, %v2254_v9  ;;  %3722 = vmatpush3.msra.mxu1 %v3242_v25  ;;  %v2907_v9 = vpop.permute.xlu1 %2906 }
 0x617   :  { %v3618_v10 = vpop.f32.mrf.mxu1  ;;  %3681 = vmatmul.mubr.msk.f32.gmra.mxu1 %vm2402_vm2, %v3615_v8  ;;  %3723 = vmatprep.subr.mxu1 %v3241_v31 }
 0x618   :  { %3724 = vmatpush3.msra.mxu1 %v3241_v31 }
 0x619   :  { %v2264_v11 = vpop.f32.mrf.mxu1  ;;  %3725 = vmatprep.subr.mxu1 %v3240_v40 }
 0x61a   :  { %3683 = vmatprep.mubr.msk.f32.mxu1 %vm2402_vm2, %v2264_v11  ;;  %3726 = vmatpush3.msra.mxu1 %v3240_v40 }
 0x61b   :  { %3684 = vmatmul.mubr.msk.f32.gmra.mxu1 %vm2402_vm2, %v3618_v10 }
 0x627   :  { %v3645_v17 = vpop.f32.mrf.mxu1 }
 0x629   :  { %v2368_v53 = vpop.f32.mrf.mxu1 }
 0x62a   :  { %3660 = vmatprep.mubr.msk.f32.mxu0 %vm2402_vm2, %v2368_v53 }
 0x62b   :  { %v3648_v13 = vpop.f32.mrf.mxu1  ;;  %3661 = vmatmul.mubr.msk.f32.vlgmr.msra.gmra.mxu0 %vm2402_vm2, %v3645_v17 }
 0x62c   :  { %3687 = vmatpush3.msra.mxu0 %v5062_v39 }
 0x62d   :  { %3688 = vmatprep.subr.mxu0 %v5066_v21  ;;  %v2378_v7 = vpop.f32.mrf.mxu1 }
 0x62e   :  { %3689 = vmatpush3.msra.mxu0 %v5066_v21  ;;  %3663 = vmatprep.mubr.msk.f32.mxu0 %vm2402_vm2, %v2378_v7 }
 0x62f   :  { %3690 = vmatprep.subr.mxu0 %v5070_v23  ;;  %v3651_v14 = vpop.f32.mrf.mxu1  ;;  %3664 = vmatmul.mubr.msk.f32.gmra.mxu0 %vm2402_vm2, %v3648_v13 }
 0x630   :  { %3691 = vmatpush3.msra.mxu0 %v5070_v23 }
 0x631   :  { %3692 = vmatprep.subr.mxu0 %v5074_v36  ;;  %v2388_v16 = vpop.f32.mrf.mxu1 }
 0x632   :  { %3693 = vmatpush3.msra.mxu0 %v5074_v36  ;;  %3666 = vmatprep.mubr.msk.f32.mxu0 %vm2402_vm2, %v2388_v16 }
 0x633   :  { %3694 = vmatprep.subr.mxu0 %v5078_v26  ;;  %3667 = vmatmul.mubr.msk.f32.gmra.mxu0 %vm2402_vm2, %v3651_v14 }
 0x634   :  { %3695 = vmatpush3.msra.mxu0 %v5078_v26  ;;  %3710 = vmatprep.mubr.msk.f32.mxu0 %vm2159_vm1, %v3228_v44 }
 0x635   :  { %3696 = vmatprep.subr.mxu0 %v5082_v27 }
 0x636   :  { %3697 = vmatpush3.msra.mxu0 %v5082_v27  ;;  %v2882_v27 = vpop.permute.xlu0 %2881 }
 0x637   :  { %3698 = vmatprep.subr.mxu0 %v5086_v37 }
 0x638   :  { %3699 = vmatpush3.msra.mxu0 %v5086_v37 }
 0x639   :  { %3700 = vmatprep.subr.mxu0 %v5090_v28 }
 0x63a   :  { %3701 = vmatpush3.msra.mxu0 %v5090_v28  ;;  %v2892_v62 = vpop.permute.xlu0 %2891 }
 0x63b   :  { %3702 = vmatprep.subr.mxu0 %v5094_v42 }
 0x63c   :  { %3703 = vmatpush3.msra.mxu0 %v5094_v42 }
 0x63d   :  { %3704 = vmatprep.subr.mxu0 %v5098_v1 }
 0x63e   :  { %3705 = vmatpush3.msra.mxu0 %v5098_v1  ;;  %v2902_v13 = vpop.permute.xlu0 %2901 }
 0x63f   :  { %3706 = vmatprep.subr.mxu0 %v5102_v29 }
 0x640   :  { %3707 = vmatpush3.msra.mxu0 %v5102_v29 }
 0x641   :  { %3708 = vmatprep.subr.mxu0 %v5106_v32 }
 0x642   :  { %3709 = vmatpush3.msra.mxu0 %v5106_v32 }
 0x643   :  { %3711 = vmatmul.mubr.msk.f32.vlgmr.msra.gmra.mxu0 %vm2159_vm1, %v3229_v18 }
 0x644   :  { %3713 = vmatprep.mubr.msk.f32.mxu0 %vm2159_vm1, %v3230_v55 }
 0x647   :  { %3714 = vmatmul.mubr.msk.f32.gmra.mxu0 %vm2159_vm1, %v3231_v47 }
 0x648   :  { %3716 = vmatprep.mubr.msk.f32.mxu0 %vm2159_vm1, %v3232_v45 }
 0x64b   :  { %3717 = vmatmul.mubr.msk.f32.gmra.mxu0 %vm2159_vm1, %v3233_v4 }
 0x6d3   :  { %v3679_v41 = vpop.f32.mrf.mxu1 }
 0x6d5   :  { %v2600_v19 = vpop.f32.mrf.mxu1 }
 0x6d7   :  { %v3682_v21 = vpop.f32.mrf.mxu1 }
 0x6d9   :  { %v2610_v22 = vpop.f32.mrf.mxu1 }
 0x6db   :  { %v3685_v23 = vpop.f32.mrf.mxu1 }
 0x6dd   :  { %v2620_v36 = vpop.f32.mrf.mxu1 }
 0x6eb   :  { %v3662_v46 = vpop.f32.mrf.mxu0 }
 0x6ec   :  { %v2606_v26 = vadd.f32 %v3679_v41, %v3662_v46 }
 0x6ed   :  { %v2487_v54 = vpop.f32.mrf.mxu0 }
 0x6ee   :  { %v2601_v28 = vadd.f32 %v2600_v19, %v2487_v54 }
 0x6ef   :  { %v3665_v56 = vpop.f32.mrf.mxu0 }
 0x6f0   :  { %v2616_v29 = vadd.f32 %v3682_v21, %v3665_v56 }
 0x6f1   :  { %v2497_v59 = vpop.f32.mrf.mxu0 }
 0x6f2   :  { %v2611_v58 = vadd.f32 %v2610_v22, %v2497_v59 }
 0x6f3   :  { %v3668_v63 = vpop.f32.mrf.mxu0 }
 0x6f4   :  { %v2626_v50 = vadd.f32 %v3685_v23, %v3668_v63 }
 0x6f5   :  { %v2507_v57 = vpop.f32.mrf.mxu0 }
 0x6f6   :  { %v2621_v3 = vadd.f32 %v2620_v36, %v2507_v57 }
 0x703   :  { %v3712_v61 = vpop.f32.mrf.mxu0 }
 0x705   :  { %v2720_v6 = vpop.f32.mrf.mxu0 }
 0x706   :  { %3727 = vmatprep.mubr.msk.f32.mxu1 %vm2402_vm2, %v2720_v6 }
 0x707   :  { %v3715_v48 = vpop.f32.mrf.mxu0  ;;  %3728 = vmatmul.mubr.msk.f32.vlgmr.msra.gmra.mxu1 %vm2402_vm2, %v3712_v61 }
 0x709   :  { %v2730_v12 = vpop.f32.mrf.mxu0 }
 0x70a   :  { %3730 = vmatprep.mubr.msk.f32.mxu1 %vm2402_vm2, %v2730_v12 }
 0x70b   :  { %v3718_v15 = vpop.f32.mrf.mxu0  ;;  %3731 = vmatmul.mubr.msk.f32.gmra.mxu1 %vm2402_vm2, %v3715_v48 }
 0x70d   :  { %v2740_v39 = vpop.f32.mrf.mxu0 }
 0x70e   :  { %3733 = vmatprep.mubr.msk.f32.mxu1 %vm2402_vm2, %v2740_v39 }
 0x70f   :  { %3734 = vmatmul.mubr.msk.f32.gmra.mxu1 %vm2402_vm2, %v3718_v15 }
 0x7c7   :  { %v3729_v37 = vpop.f32.mrf.mxu1 }
 0x7c8   :  { %v2868_v42 = vadd.f32 %v3729_v37, %v2606_v26 }
 0x7c9   :  { %v2838_v1 = vpop.f32.mrf.mxu1 }
 0x7ca   :  { %v2910_v32 = vadd.f32 %v2887_v24, %v2868_v42  ;;  %v2867_v51 = vadd.f32 %v2838_v1, %v2601_v28 }
 0x7cb   :  { %v3732_v43 = vpop.f32.mrf.mxu1 }
 0x7cc   :  { %v3251_v60 = vmul.f32 -1.442695, %v2910_v32  ;;  %v2909_v35 = vadd.f32 %v2882_v27, %v2867_v51  ;;  %v2870_v49 = vadd.f32 %v3732_v43, %v2616_v29 }
 0x7cd   :  { %v2848_v0 = vpop.f32.mrf.mxu1 }
 0x7ce   :  { %3887 = vpow2.f32 %v3251_v60  ;;  %v3250_v20 = vmul.f32 -1.442695, %v2909_v35  ;;  %v2912_v38 = vadd.f32 %v2897_v33, %v2870_v49  ;;  %v2869_v2 = vadd.f32 %v2848_v0, %v2611_v58 }
 0x7cf   :  { %v3735_v30 = vpop.f32.mrf.mxu1 }
 0x7d0   :  { %3889 = vpow2.f32 %v3250_v20  ;;  %v3253_v52 = vmul.f32 -1.442695, %v2912_v38  ;;  %v2911_v5 = vadd.f32 %v2892_v62, %v2869_v2  ;;  %v2872_v8 = vadd.f32 %v3735_v30, %v2626_v50 }
 0x7d1   :  { %v2858_v10 = vpop.f32.mrf.mxu1 }
 0x7d2   :  { %3891 = vpow2.f32 %v3253_v52  ;;  %v3252_v11 = vmul.f32 -1.442695, %v2911_v5  ;;  %v2914_v17 = vadd.f32 %v2907_v9, %v2872_v8  ;;  %v2871_v53 = vadd.f32 %v2858_v10, %v2621_v3 }
 0x7d4   :  { %3893 = vpow2.f32 %v3252_v11  ;;  %v3255_v7 = vmul.f32 -1.442695, %v2914_v17  ;;  %v2913_v14 = vadd.f32 %v2902_v13, %v2871_v53 }
 0x7d6   :  { %3895 = vpow2.f32 %v3255_v7  ;;  %v3254_v16 = vmul.f32 -1.442695, %v2913_v14 }
 0x7d8   :  { %3897 = vpow2.f32 %v3254_v16 }
 0x7db   :  { %v3888_v44 = vpop.eup %3887 }
 0x7dc   :  { %v2934_v18 = vadd.f32 1.0, %v3888_v44 }
 0x7dd   :  { %v3890_v55 = vpop.eup %3889 }
 0x7de   :  { %3899 = vrcp.f32 %v2934_v18  ;;  %v2933_v47 = vadd.f32 1.0, %v3890_v55 }
 0x7df   :  { %v3892_v45 = vpop.eup %3891 }
 0x7e0   :  { %3901 = vrcp.f32 %v2933_v47  ;;  %v2936_v4 = vadd.f32 1.0, %v3892_v45 }
 0x7e1   :  { %v3894_v34 = vpop.eup %3893 }
 0x7e2   :  { %3903 = vrcp.f32 %v2936_v4  ;;  %v2935_v25 = vadd.f32 1.0, %v3894_v34 }
 0x7e3   :  { %v3896_v31 = vpop.eup %3895 }
 0x7e4   :  { %3905 = vrcp.f32 %v2935_v25  ;;  %v2938_v40 = vadd.f32 1.0, %v3896_v31 }
 0x7e5   :  { %v3898_v46 = vpop.eup %3897 }
 0x7e6   :  { %3907 = vrcp.f32 %v2938_v40  ;;  %v2937_v54 = vadd.f32 1.0, %v3898_v46 }
 0x7e8   :  { %3909 = vrcp.f32 %v2937_v54 }
 0x7eb   :  { %v3900_v56 = vpop.eup %3899 }
 0x7ec   :  { %2953 = vst.msk [vmem:[#allocation2 + $0x8] sm:$0xff] %vm2951_vm3, %v3900_v56 }
 0x7ed   :  { %v3902_v59 = vpop.eup %3901 }
 0x7ee   :  { %2952 = vst.msk [vmem:[#allocation2] sm:$0xff] %vm2951_vm3, %v3902_v59 }
 0x7ef   :  { %v3904_v63 = vpop.eup %3903 }
 0x7f0   :  { %2955 = vst.msk [vmem:[#allocation2 + $0x18] sm:$0xff] %vm2951_vm3, %v3904_v63 }
 0x7f1   :  { %v3906_v57 = vpop.eup %3905 }
 0x7f2   :  { %2954 = vst.msk [vmem:[#allocation2 + $0x10] sm:$0xff] %vm2951_vm3, %v3906_v57 }
 0x7f3   :  { %v3908_v61 = vpop.eup %3907 }
 0x7f4   :  { %2957 = vst.msk [vmem:[#allocation2 + $0x28] sm:$0xff] %vm2951_vm3, %v3908_v61 }
 0x7f5   :  { %v3910_v6 = vpop.eup %3909 }
 0x7f6   :  { %2956 = vst.msk [vmem:[#allocation2 + $0x20] sm:$0xff] %vm2951_vm3, %v3910_v6 }
 0x7f7   :  { %3922 = shalt.err (!%p3919_p4)
}
 0x7f8   :  { %s3936_s28 = smov 128   ;;  %s3937_s29 = smov 8  }
 0x7f9   :  { %2969 = dma.vmem_to_hbm [thread:$0]  %s2964_s26, 768, %s5281_s10, [#allocation3], %s3936_s28, %s3936_s28, %s3937_s29  }
 0x7fa   :  { %3931 = dma.done.wait [#allocation3], 768  }
 0x7fb   :  { %3932 = vsyncadd [#allocation3], 4294966528 }
 0x7fc   :  { %2973 = vsyncpa [#allocation3], 1 }

</bundles_post_ra>
